<compile_context>
chip_gen: v7x
topology: tpu7x:2x2x1
jax: 0.10.0
libtpu: 0.0.40
codegen_flags: <defaults>
</compile_context>

<pallas_src>
import jax
import jax.numpy as jnp
from jax.experimental import pallas as pl
from jax.experimental.pallas import tpu as pltpu


# ----------------------------------------------------------------------------
# Fused kernel body
# ----------------------------------------------------------------------------
def _make_resblock_kernel(c, lw, offsets, mxu_dtype):
    """conv3x3 -> +bias -> ReLU -> conv3x3 -> +residual, fully fused.

    Ref shapes (per grid step):
      x_ref    : (C, LW)     f32   LW = images_per_step * H*W (packed on lanes)
      w1_ref   : (C, 9*C)    bf16  conv1 weights, columns ordered (tap, cin)
      b1_ref   : (C, 1)      f32
      w2_ref   : (C, 9*C)    bf16  conv2 weights
      mask_ref : (9, 1, LW)  f32   per-tap source-validity masks (conv padding)
      o_ref    : (C, LW)     f32
      col_ref  : (9*C, LW)   bf16  VMEM im2col slab (K-packed MXU operand)
    """
    center_tap = 4  # (di, dj) == (1, 1): always valid, no mask / no shift

    def shifted(v, off):
        # result[:, p] == v[:, p + off] at every position where the tap is
        # valid; circularly wrapped lanes only ever land on masked positions.
        return v if off == 0 else jnp.roll(v, -off, axis=-1)

    def build_col(col_ref, v, mask_ref):
        # Build the (9*C, LW) K-packed im2col slab from 9 shifted+masked
        # copies of `v` (f32 VPU math, cast to bf16 at the store).
        for t, off in enumerate(offsets):
            tap = shifted(v, off)
            if t != center_tap:
                tap = tap * mask_ref[t]
            col_ref[t * c:(t + 1) * c, :] = tap.astype(mxu_dtype)

    def kernel(x_ref, w1_ref, b1_ref, w2_ref, mask_ref, o_ref, col_ref):
        x = x_ref[...]                                         # (C, LW) f32

        # ---- conv1: one K=9*C MXU contraction, f32 accumulation.
        build_col(col_ref, x, mask_ref)
        hid = jnp.dot(w1_ref[...], col_ref[...],
                      preferred_element_type=jnp.float32)
        hid = jnp.maximum(hid + b1_ref[...], 0.0)              # bias + ReLU (f32)

        # ---- conv2 on hid + residual add (exact f32 x).
        build_col(col_ref, hid, mask_ref)
        y = jnp.dot(w2_ref[...], col_ref[...],
                    preferred_element_type=jnp.float32)
        o_ref[...] = (x + y).astype(o_ref.dtype)

    return kernel


# ----------------------------------------------------------------------------
# Wrapper: layout plumbing + pallas_call
# ----------------------------------------------------------------------------
def residual_block_forward(x, w1, b1, w2, *, images_per_step=None,
                           mxu_dtype=jnp.bfloat16):
    """x: (N, C, H, W) NCHW; w1, w2: (C, C, 3, 3) OIHW; b1: (C,)."""
    batch, chan, height, width = x.shape
    assert w1.shape == (chan, chan, 3, 3) and w2.shape == (chan, chan, 3, 3)
    assert b1.shape == (chan,)
    # The residual add requires dim_in == dim_out (as in the PyTorch module).
    assert chan % 8 == 0, "channel count must be a multiple of 8 (sublane tile)"
    l = height * width

    # Images per grid step (packed along the lane axis).  Keep >= 2 grid steps
    # so both v7x TensorCores get work; cap the packed lane width.
    if images_per_step is None:
        nb = max(1, min(batch // 2, max(1, 2048 // l)))
    else:
        nb = max(1, min(int(images_per_step), batch))
    npad = -(-batch // nb) * nb
    nsteps = npad // nb
    lw = nb * l

    xf = x.astype(jnp.float32).reshape(batch, chan, l)
    if npad != batch:
        xf = jnp.concatenate(
            [xf, jnp.zeros((npad - batch, chan, l), jnp.float32)], axis=0)
    # (Npad, C, L) -> (nsteps, C, NB*L): batch chunk packed on lanes.
    xp = xf.reshape(nsteps, nb, chan, l).transpose(0, 2, 1, 3)
    xp = xp.reshape(nsteps, chan, lw)

    # OIHW -> (Cout, 9*Cin), column order (di, dj, cin) = im2col row order.
    w1p = jnp.transpose(w1, (0, 2, 3, 1)).reshape(chan, 9 * chan).astype(mxu_dtype)
    w2p = jnp.transpose(w2, (0, 2, 3, 1)).reshape(chan, 9 * chan).astype(mxu_dtype)
    b1c = b1.reshape(chan, 1).astype(jnp.float32)

    # Per-tap validity masks: mask[t, 0, p] == 1 iff tap t's source pixel for
    # output position p lies inside the image (this realizes the conv padding).
    pos = jnp.arange(l)
    prow, pcol = pos // width, pos % width
    masks = []
    for di in range(3):
        for dj in range(3):
            rv = (prow + (di - 1) >= 0) & (prow + (di - 1) < height)
            cv = (pcol + (dj - 1) >= 0) & (pcol + (dj - 1) < width)
            masks.append((rv & cv).astype(jnp.float32))
    mask = jnp.stack(masks, axis=0).reshape(9, 1, l)
    mask = jnp.tile(mask, (1, 1, nb))                          # (9, 1, LW)

    offsets = tuple((di - 1) * width + (dj - 1)
                    for di in range(3) for dj in range(3))
    kernel = _make_resblock_kernel(chan, lw, offsets, mxu_dtype)

    out = pl.pallas_call(
        kernel,
        grid=(nsteps,),
        in_specs=[
            pl.BlockSpec((None, chan, lw), lambda i: (i, 0, 0)),   # x (packed)
            pl.BlockSpec((chan, 9 * chan), lambda i: (0, 0)),      # w1 packed
            pl.BlockSpec((chan, 1), lambda i: (0, 0)),             # b1
            pl.BlockSpec((chan, 9 * chan), lambda i: (0, 0)),      # w2 packed
            pl.BlockSpec((9, 1, lw), lambda i: (0, 0, 0)),         # tap masks
        ],
        out_specs=pl.BlockSpec((None, chan, lw), lambda i: (i, 0, 0)),
        out_shape=jax.ShapeDtypeStruct((nsteps, chan, lw), jnp.float32),
        scratch_shapes=[pltpu.VMEM((9 * chan, lw), mxu_dtype)],
        compiler_params=pltpu.CompilerParams(
            dimension_semantics=("parallel",)),
    )(xp, w1p, b1c, w2p, mask)

    # (nsteps, C, NB*L) -> (N, C, H, W)
    out = out.reshape(nsteps, chan, nb, l).transpose(0, 2, 1, 3)
    out = out.reshape(npad, chan, height, width)[:batch]
    return out


# ----------------------------------------------------------------------------
# Pure-JAX reference (correctness check)
# ----------------------------------------------------------------------------
def _residual_block_reference(x, w1, b1, w2):
    dn = ("NCHW", "OIHW", "NCHW")
    h = jax.lax.conv_general_dilated(
        x, w1, (1, 1), ((1, 1), (1, 1)), dimension_numbers=dn,
        precision=jax.lax.Precision.HIGHEST)
    h = jnp.maximum(h + b1[None, :, None, None], 0.0)
    y = jax.lax.conv_general_dilated(
        h, w2, (1, 1), ((1, 1), (1, 1)), dimension_numbers=dn,
        precision=jax.lax.Precision.HIGHEST)
    return x + y


if __name__ == "__main__":
    # ResidualBlock(dim_in=32, dim_out=32) on a 2x32x16x16 NCHW input.
    N, C, H, W = 2, 32, 16, 16
    key = jax.random.PRNGKey(0)
    kx, kw1, kb1, kw2 = jax.random.split(key, 4)

    x = jax.random.normal(kx, (N, C, H, W), jnp.float32)
    w1 = jax.random.normal(kw1, (C, C, 3, 3), jnp.float32) * 0.05
    b1 = jax.random.normal(kb1, (C,), jnp.float32) * 0.05
    w2 = jax.random.normal(kw2, (C, C, 3, 3), jnp.float32) * 0.05

    out = jax.jit(residual_block_forward)(x, w1, b1, w2)
    out = jax.block_until_ready(out)

    ref = _residual_block_reference(x, w1, b1, w2)

    assert out.shape == (N, C, H, W), out.shape
    assert bool(jnp.all(jnp.isfinite(out)))
    max_err = float(jnp.max(jnp.abs(out - ref)))
    # bf16 MXU operands with f32 accumulation: expected max abs error ~1e-2
    # vs the HIGHEST-precision f32 reference; real indexing bugs give O(1).
    assert max_err < 2e-2, f"max abs error vs reference: {max_err}"
    print("KERNEL_OK")
</pallas_src>

<mosaic_0001>
module attributes {stable_mosaic.version = 11 : i64} {
  func.func @kernel(%arg0: i32, %arg1: memref<1x32x256xf32, #tpu.memory_space<vmem>>, %arg2: memref<32x288xbf16, #tpu.memory_space<vmem>>, %arg3: memref<32x1xf32, #tpu.memory_space<vmem>>, %arg4: memref<32x288xbf16, #tpu.memory_space<vmem>>, %arg5: memref<9x1x256xf32, #tpu.memory_space<vmem>>, %arg6: memref<1x32x256xf32, #tpu.memory_space<vmem>>, %arg7: memref<288x256xbf16, #tpu.memory_space<vmem>>) attributes {dimension_semantics = [#tpu.dimension_semantics<parallel>], iteration_bounds = array<i64: 2>, scalar_prefetch = 0 : i64, scratch_operands = 1 : i64, tpu.core_type = #tpu.core_type<tc>, window_params = [{transform_indices = @transform_0, window_bounds = array<i64: 1, 32, 256>}, {pipeline_mode = #tpu.pipeline_mode<synchronous>, transform_indices = @transform_1, window_bounds = array<i64: 32, 288>}, {pipeline_mode = #tpu.pipeline_mode<synchronous>, transform_indices = @transform_2, window_bounds = array<i64: 32, 1>}, {pipeline_mode = #tpu.pipeline_mode<synchronous>, transform_indices = @transform_3, window_bounds = array<i64: 32, 288>}, {pipeline_mode = #tpu.pipeline_mode<synchronous>, transform_indices = @transform_4, window_bounds = array<i64: 9, 1, 256>}, {transform_indices = @transform_5, window_bounds = array<i64: 1, 32, 256>}]} {
    %c0 = arith.constant 0 : index
    %c0_0 = arith.constant 0 : index
    %c0_1 = arith.constant 0 : index
    %0 = vector.load %arg1[%c0, %c0_0, %c0_1] : memref<1x32x256xf32, #tpu.memory_space<vmem>>, vector<1x32x256xf32>
    %1 = vector.shape_cast %0 : vector<1x32x256xf32> to vector<32x256xf32>
    %2 = vector.extract_strided_slice %1 {offsets = [0, 239], sizes = [32, 17], strides = [1, 1]} : vector<32x256xf32> to vector<32x17xf32>
    %3 = vector.extract_strided_slice %1 {offsets = [0, 0], sizes = [32, 239], strides = [1, 1]} : vector<32x256xf32> to vector<32x239xf32>
    %4 = tpu.concatenate %2, %3 in 1 : vector<32x17xf32>, vector<32x239xf32> -> vector<32x256xf32>
    %c0_2 = arith.constant 0 : index
    %c0_3 = arith.constant 0 : index
    %c0_4 = arith.constant 0 : index
    %5 = vector.load %arg5[%c0_2, %c0_3, %c0_4] : memref<9x1x256xf32, #tpu.memory_space<vmem>>, vector<1x1x256xf32>
    %6 = vector.shape_cast %5 : vector<1x1x256xf32> to vector<1x256xf32>
    %7 = vector.broadcast %6 : vector<1x256xf32> to vector<32x256xf32>
    %8 = arith.mulf %4, %7 : vector<32x256xf32>
    %9 = arith.truncf %8 : vector<32x256xf32> to vector<32x256xbf16>
    %c0_5 = arith.constant 0 : index
    %c0_6 = arith.constant 0 : index
    %10 = vector.load %arg7[%c0_5, %c0_6] : memref<288x256xbf16, #tpu.memory_space<vmem>>, vector<32x256xbf16>
    tpu.vector_store %arg7[%c0_5, %c0_6], %9 {strides = array<i32>} : memref<288x256xbf16, #tpu.memory_space<vmem>>, vector<32x256xbf16>,
    %11 = vector.extract_strided_slice %1 {offsets = [0, 240], sizes = [32, 16], strides = [1, 1]} : vector<32x256xf32> to vector<32x16xf32>
    %12 = vector.extract_strided_slice %1 {offsets = [0, 0], sizes = [32, 240], strides = [1, 1]} : vector<32x256xf32> to vector<32x240xf32>
    %13 = tpu.concatenate %11, %12 in 1 : vector<32x16xf32>, vector<32x240xf32> -> vector<32x256xf32>
    %c1 = arith.constant 1 : index
    %c0_7 = arith.constant 0 : index
    %c0_8 = arith.constant 0 : index
    %14 = vector.load %arg5[%c1, %c0_7, %c0_8] : memref<9x1x256xf32, #tpu.memory_space<vmem>>, vector<1x1x256xf32>
    %15 = vector.shape_cast %14 : vector<1x1x256xf32> to vector<1x256xf32>
    %16 = vector.broadcast %15 : vector<1x256xf32> to vector<32x256xf32>
    %17 = arith.mulf %13, %16 : vector<32x256xf32>
    %18 = arith.truncf %17 : vector<32x256xf32> to vector<32x256xbf16>
    %c32 = arith.constant 32 : index
    %c0_9 = arith.constant 0 : index
    %19 = vector.load %arg7[%c32, %c0_9] : memref<288x256xbf16, #tpu.memory_space<vmem>>, vector<32x256xbf16>
    tpu.vector_store %arg7[%c32, %c0_9], %18 {strides = array<i32>} : memref<288x256xbf16, #tpu.memory_space<vmem>>, vector<32x256xbf16>,
    %20 = vector.extract_strided_slice %1 {offsets = [0, 241], sizes = [32, 15], strides = [1, 1]} : vector<32x256xf32> to vector<32x15xf32>
    %21 = vector.extract_strided_slice %1 {offsets = [0, 0], sizes = [32, 241], strides = [1, 1]} : vector<32x256xf32> to vector<32x241xf32>
    %22 = tpu.concatenate %20, %21 in 1 : vector<32x15xf32>, vector<32x241xf32> -> vector<32x256xf32>
    %c2 = arith.constant 2 : index
    %c0_10 = arith.constant 0 : index
    %c0_11 = arith.constant 0 : index
    %23 = vector.load %arg5[%c2, %c0_10, %c0_11] : memref<9x1x256xf32, #tpu.memory_space<vmem>>, vector<1x1x256xf32>
    %24 = vector.shape_cast %23 : vector<1x1x256xf32> to vector<1x256xf32>
    %25 = vector.broadcast %24 : vector<1x256xf32> to vector<32x256xf32>
    %26 = arith.mulf %22, %25 : vector<32x256xf32>
    %27 = arith.truncf %26 : vector<32x256xf32> to vector<32x256xbf16>
    %c64 = arith.constant 64 : index
    %c0_12 = arith.constant 0 : index
    %28 = vector.load %arg7[%c64, %c0_12] : memref<288x256xbf16, #tpu.memory_space<vmem>>, vector<32x256xbf16>
    tpu.vector_store %arg7[%c64, %c0_12], %27 {strides = array<i32>} : memref<288x256xbf16, #tpu.memory_space<vmem>>, vector<32x256xbf16>,
    %29 = vector.extract_strided_slice %1 {offsets = [0, 255], sizes = [32, 1], strides = [1, 1]} : vector<32x256xf32> to vector<32x1xf32>
    %30 = vector.extract_strided_slice %1 {offsets = [0, 0], sizes = [32, 255], strides = [1, 1]} : vector<32x256xf32> to vector<32x255xf32>
    %31 = tpu.concatenate %29, %30 in 1 : vector<32x1xf32>, vector<32x255xf32> -> vector<32x256xf32>
    %c3 = arith.constant 3 : index
    %c0_13 = arith.constant 0 : index
    %c0_14 = arith.constant 0 : index
    %32 = vector.load %arg5[%c3, %c0_13, %c0_14] : memref<9x1x256xf32, #tpu.memory_space<vmem>>, vector<1x1x256xf32>
    %33 = vector.shape_cast %32 : vector<1x1x256xf32> to vector<1x256xf32>
    %34 = vector.broadcast %33 : vector<1x256xf32> to vector<32x256xf32>
    %35 = arith.mulf %31, %34 : vector<32x256xf32>
    %36 = arith.truncf %35 : vector<32x256xf32> to vector<32x256xbf16>
    %c96 = arith.constant 96 : index
    %c0_15 = arith.constant 0 : index
    %37 = vector.load %arg7[%c96, %c0_15] : memref<288x256xbf16, #tpu.memory_space<vmem>>, vector<32x256xbf16>
    tpu.vector_store %arg7[%c96, %c0_15], %36 {strides = array<i32>} : memref<288x256xbf16, #tpu.memory_space<vmem>>, vector<32x256xbf16>,
    %38 = arith.truncf %1 : vector<32x256xf32> to vector<32x256xbf16>
    %c128 = arith.constant 128 : index
    %c0_16 = arith.constant 0 : index
    %39 = vector.load %arg7[%c128, %c0_16] : memref<288x256xbf16, #tpu.memory_space<vmem>>, vector<32x256xbf16>
    tpu.vector_store %arg7[%c128, %c0_16], %38 {strides = array<i32>} : memref<288x256xbf16, #tpu.memory_space<vmem>>, vector<32x256xbf16>,
    %40 = vector.extract_strided_slice %1 {offsets = [0, 1], sizes = [32, 255], strides = [1, 1]} : vector<32x256xf32> to vector<32x255xf32>
    %41 = vector.extract_strided_slice %1 {offsets = [0, 0], sizes = [32, 1], strides = [1, 1]} : vector<32x256xf32> to vector<32x1xf32>
    %42 = tpu.concatenate %40, %41 in 1 : vector<32x255xf32>, vector<32x1xf32> -> vector<32x256xf32>
    %c5 = arith.constant 5 : index
    %c0_17 = arith.constant 0 : index
    %c0_18 = arith.constant 0 : index
    %43 = vector.load %arg5[%c5, %c0_17, %c0_18] : memref<9x1x256xf32, #tpu.memory_space<vmem>>, vector<1x1x256xf32>
    %44 = vector.shape_cast %43 : vector<1x1x256xf32> to vector<1x256xf32>
    %45 = vector.broadcast %44 : vector<1x256xf32> to vector<32x256xf32>
    %46 = arith.mulf %42, %45 : vector<32x256xf32>
    %47 = arith.truncf %46 : vector<32x256xf32> to vector<32x256xbf16>
    %c160 = arith.constant 160 : index
    %c0_19 = arith.constant 0 : index
    %48 = vector.load %arg7[%c160, %c0_19] : memref<288x256xbf16, #tpu.memory_space<vmem>>, vector<32x256xbf16>
    tpu.vector_store %arg7[%c160, %c0_19], %47 {strides = array<i32>} : memref<288x256xbf16, #tpu.memory_space<vmem>>, vector<32x256xbf16>,
    %49 = vector.extract_strided_slice %1 {offsets = [0, 15], sizes = [32, 241], strides = [1, 1]} : vector<32x256xf32> to vector<32x241xf32>
    %50 = vector.extract_strided_slice %1 {offsets = [0, 0], sizes = [32, 15], strides = [1, 1]} : vector<32x256xf32> to vector<32x15xf32>
    %51 = tpu.concatenate %49, %50 in 1 : vector<32x241xf32>, vector<32x15xf32> -> vector<32x256xf32>
    %c6 = arith.constant 6 : index
    %c0_20 = arith.constant 0 : index
    %c0_21 = arith.constant 0 : index
    %52 = vector.load %arg5[%c6, %c0_20, %c0_21] : memref<9x1x256xf32, #tpu.memory_space<vmem>>, vector<1x1x256xf32>
    %53 = vector.shape_cast %52 : vector<1x1x256xf32> to vector<1x256xf32>
    %54 = vector.broadcast %53 : vector<1x256xf32> to vector<32x256xf32>
    %55 = arith.mulf %51, %54 : vector<32x256xf32>
    %56 = arith.truncf %55 : vector<32x256xf32> to vector<32x256xbf16>
    %c192 = arith.constant 192 : index
    %c0_22 = arith.constant 0 : index
    %57 = vector.load %arg7[%c192, %c0_22] : memref<288x256xbf16, #tpu.memory_space<vmem>>, vector<32x256xbf16>
    tpu.vector_store %arg7[%c192, %c0_22], %56 {strides = array<i32>} : memref<288x256xbf16, #tpu.memory_space<vmem>>, vector<32x256xbf16>,
    %58 = vector.extract_strided_slice %1 {offsets = [0, 16], sizes = [32, 240], strides = [1, 1]} : vector<32x256xf32> to vector<32x240xf32>
    %59 = vector.extract_strided_slice %1 {offsets = [0, 0], sizes = [32, 16], strides = [1, 1]} : vector<32x256xf32> to vector<32x16xf32>
    %60 = tpu.concatenate %58, %59 in 1 : vector<32x240xf32>, vector<32x16xf32> -> vector<32x256xf32>
    %c7 = arith.constant 7 : index
    %c0_23 = arith.constant 0 : index
    %c0_24 = arith.constant 0 : index
    %61 = vector.load %arg5[%c7, %c0_23, %c0_24] : memref<9x1x256xf32, #tpu.memory_space<vmem>>, vector<1x1x256xf32>
    %62 = vector.shape_cast %61 : vector<1x1x256xf32> to vector<1x256xf32>
    %63 = vector.broadcast %62 : vector<1x256xf32> to vector<32x256xf32>
    %64 = arith.mulf %60, %63 : vector<32x256xf32>
    %65 = arith.truncf %64 : vector<32x256xf32> to vector<32x256xbf16>
    %c224 = arith.constant 224 : index
    %c0_25 = arith.constant 0 : index
    %66 = vector.load %arg7[%c224, %c0_25] : memref<288x256xbf16, #tpu.memory_space<vmem>>, vector<32x256xbf16>
    tpu.vector_store %arg7[%c224, %c0_25], %65 {strides = array<i32>} : memref<288x256xbf16, #tpu.memory_space<vmem>>, vector<32x256xbf16>,
    %67 = vector.extract_strided_slice %1 {offsets = [0, 17], sizes = [32, 239], strides = [1, 1]} : vector<32x256xf32> to vector<32x239xf32>
    %68 = vector.extract_strided_slice %1 {offsets = [0, 0], sizes = [32, 17], strides = [1, 1]} : vector<32x256xf32> to vector<32x17xf32>
    %69 = tpu.concatenate %67, %68 in 1 : vector<32x239xf32>, vector<32x17xf32> -> vector<32x256xf32>
    %c8 = arith.constant 8 : index
    %c0_26 = arith.constant 0 : index
    %c0_27 = arith.constant 0 : index
    %70 = vector.load %arg5[%c8, %c0_26, %c0_27] : memref<9x1x256xf32, #tpu.memory_space<vmem>>, vector<1x1x256xf32>
    %71 = vector.shape_cast %70 : vector<1x1x256xf32> to vector<1x256xf32>
    %72 = vector.broadcast %71 : vector<1x256xf32> to vector<32x256xf32>
    %73 = arith.mulf %69, %72 : vector<32x256xf32>
    %74 = arith.truncf %73 : vector<32x256xf32> to vector<32x256xbf16>
    %c256 = arith.constant 256 : index
    %c0_28 = arith.constant 0 : index
    %75 = vector.load %arg7[%c256, %c0_28] : memref<288x256xbf16, #tpu.memory_space<vmem>>, vector<32x256xbf16>
    tpu.vector_store %arg7[%c256, %c0_28], %74 {strides = array<i32>} : memref<288x256xbf16, #tpu.memory_space<vmem>>, vector<32x256xbf16>,
    %c0_29 = arith.constant 0 : index
    %c0_30 = arith.constant 0 : index
    %76 = vector.load %arg2[%c0_29, %c0_30] : memref<32x288xbf16, #tpu.memory_space<vmem>>, vector<32x288xbf16>
    %c0_31 = arith.constant 0 : index
    %c0_32 = arith.constant 0 : index
    %77 = vector.load %arg7[%c0_31, %c0_32] : memref<288x256xbf16, #tpu.memory_space<vmem>>, vector<288x256xbf16>
    %cst = arith.constant dense<0.000000e+00> : vector<32x256xf32>
    %78 = tpu.matmul %76, %77, %cst {dimension_numbers = #tpu.dot_dimension_numbers<[1], [0], [0], [1], [0, 0, 1, 1], [], []>} : vector<32x288xbf16>, vector<288x256xbf16>, vector<32x256xf32> -> vector<32x256xf32>
    %c0_33 = arith.constant 0 : index
    %c0_34 = arith.constant 0 : index
    %79 = vector.load %arg3[%c0_33, %c0_34] : memref<32x1xf32, #tpu.memory_space<vmem>>, vector<32x1xf32>
    %80 = vector.broadcast %79 : vector<32x1xf32> to vector<32x256xf32>
    %81 = arith.addf %78, %80 : vector<32x256xf32>
    %cst_35 = arith.constant 0.000000e+00 : f32
    %82 = vector.broadcast %cst_35 : f32 to vector<32x256xf32>
    %83 = arith.maximumf %81, %82 : vector<32x256xf32>
    %84 = vector.extract_strided_slice %83 {offsets = [0, 239], sizes = [32, 17], strides = [1, 1]} : vector<32x256xf32> to vector<32x17xf32>
    %85 = vector.extract_strided_slice %83 {offsets = [0, 0], sizes = [32, 239], strides = [1, 1]} : vector<32x256xf32> to vector<32x239xf32>
    %86 = tpu.concatenate %84, %85 in 1 : vector<32x17xf32>, vector<32x239xf32> -> vector<32x256xf32>
    %c0_36 = arith.constant 0 : index
    %c0_37 = arith.constant 0 : index
    %c0_38 = arith.constant 0 : index
    %87 = vector.load %arg5[%c0_36, %c0_37, %c0_38] : memref<9x1x256xf32, #tpu.memory_space<vmem>>, vector<1x1x256xf32>
    %88 = vector.shape_cast %87 : vector<1x1x256xf32> to vector<1x256xf32>
    %89 = vector.broadcast %88 : vector<1x256xf32> to vector<32x256xf32>
    %90 = arith.mulf %86, %89 : vector<32x256xf32>
    %91 = arith.truncf %90 : vector<32x256xf32> to vector<32x256xbf16>
    %c0_39 = arith.constant 0 : index
    %c0_40 = arith.constant 0 : index
    %92 = vector.load %arg7[%c0_39, %c0_40] : memref<288x256xbf16, #tpu.memory_space<vmem>>, vector<32x256xbf16>
    tpu.vector_store %arg7[%c0_39, %c0_40], %91 {strides = array<i32>} : memref<288x256xbf16, #tpu.memory_space<vmem>>, vector<32x256xbf16>,
    %93 = vector.extract_strided_slice %83 {offsets = [0, 240], sizes = [32, 16], strides = [1, 1]} : vector<32x256xf32> to vector<32x16xf32>
    %94 = vector.extract_strided_slice %83 {offsets = [0, 0], sizes = [32, 240], strides = [1, 1]} : vector<32x256xf32> to vector<32x240xf32>
    %95 = tpu.concatenate %93, %94 in 1 : vector<32x16xf32>, vector<32x240xf32> -> vector<32x256xf32>
    %c1_41 = arith.constant 1 : index
    %c0_42 = arith.constant 0 : index
    %c0_43 = arith.constant 0 : index
    %96 = vector.load %arg5[%c1_41, %c0_42, %c0_43] : memref<9x1x256xf32, #tpu.memory_space<vmem>>, vector<1x1x256xf32>
    %97 = vector.shape_cast %96 : vector<1x1x256xf32> to vector<1x256xf32>
    %98 = vector.broadcast %97 : vector<1x256xf32> to vector<32x256xf32>
    %99 = arith.mulf %95, %98 : vector<32x256xf32>
    %100 = arith.truncf %99 : vector<32x256xf32> to vector<32x256xbf16>
    %c32_44 = arith.constant 32 : index
    %c0_45 = arith.constant 0 : index
    %101 = vector.load %arg7[%c32_44, %c0_45] : memref<288x256xbf16, #tpu.memory_space<vmem>>, vector<32x256xbf16>
    tpu.vector_store %arg7[%c32_44, %c0_45], %100 {strides = array<i32>} : memref<288x256xbf16, #tpu.memory_space<vmem>>, vector<32x256xbf16>,
    %102 = vector.extract_strided_slice %83 {offsets = [0, 241], sizes = [32, 15], strides = [1, 1]} : vector<32x256xf32> to vector<32x15xf32>
    %103 = vector.extract_strided_slice %83 {offsets = [0, 0], sizes = [32, 241], strides = [1, 1]} : vector<32x256xf32> to vector<32x241xf32>
    %104 = tpu.concatenate %102, %103 in 1 : vector<32x15xf32>, vector<32x241xf32> -> vector<32x256xf32>
    %c2_46 = arith.constant 2 : index
    %c0_47 = arith.constant 0 : index
    %c0_48 = arith.constant 0 : index
    %105 = vector.load %arg5[%c2_46, %c0_47, %c0_48] : memref<9x1x256xf32, #tpu.memory_space<vmem>>, vector<1x1x256xf32>
    %106 = vector.shape_cast %105 : vector<1x1x256xf32> to vector<1x256xf32>
    %107 = vector.broadcast %106 : vector<1x256xf32> to vector<32x256xf32>
    %108 = arith.mulf %104, %107 : vector<32x256xf32>
    %109 = arith.truncf %108 : vector<32x256xf32> to vector<32x256xbf16>
    %c64_49 = arith.constant 64 : index
    %c0_50 = arith.constant 0 : index
    %110 = vector.load %arg7[%c64_49, %c0_50] : memref<288x256xbf16, #tpu.memory_space<vmem>>, vector<32x256xbf16>
    tpu.vector_store %arg7[%c64_49, %c0_50], %109 {strides = array<i32>} : memref<288x256xbf16, #tpu.memory_space<vmem>>, vector<32x256xbf16>,
    %111 = vector.extract_strided_slice %83 {offsets = [0, 255], sizes = [32, 1], strides = [1, 1]} : vector<32x256xf32> to vector<32x1xf32>
    %112 = vector.extract_strided_slice %83 {offsets = [0, 0], sizes = [32, 255], strides = [1, 1]} : vector<32x256xf32> to vector<32x255xf32>
    %113 = tpu.concatenate %111, %112 in 1 : vector<32x1xf32>, vector<32x255xf32> -> vector<32x256xf32>
    %c3_51 = arith.constant 3 : index
    %c0_52 = arith.constant 0 : index
    %c0_53 = arith.constant 0 : index
    %114 = vector.load %arg5[%c3_51, %c0_52, %c0_53] : memref<9x1x256xf32, #tpu.memory_space<vmem>>, vector<1x1x256xf32>
    %115 = vector.shape_cast %114 : vector<1x1x256xf32> to vector<1x256xf32>
    %116 = vector.broadcast %115 : vector<1x256xf32> to vector<32x256xf32>
    %117 = arith.mulf %113, %116 : vector<32x256xf32>
    %118 = arith.truncf %117 : vector<32x256xf32> to vector<32x256xbf16>
    %c96_54 = arith.constant 96 : index
    %c0_55 = arith.constant 0 : index
    %119 = vector.load %arg7[%c96_54, %c0_55] : memref<288x256xbf16, #tpu.memory_space<vmem>>, vector<32x256xbf16>
    tpu.vector_store %arg7[%c96_54, %c0_55], %118 {strides = array<i32>} : memref<288x256xbf16, #tpu.memory_space<vmem>>, vector<32x256xbf16>,
    %120 = arith.truncf %83 : vector<32x256xf32> to vector<32x256xbf16>
    %c128_56 = arith.constant 128 : index
    %c0_57 = arith.constant 0 : index
    %121 = vector.load %arg7[%c128_56, %c0_57] : memref<288x256xbf16, #tpu.memory_space<vmem>>, vector<32x256xbf16>
    tpu.vector_store %arg7[%c128_56, %c0_57], %120 {strides = array<i32>} : memref<288x256xbf16, #tpu.memory_space<vmem>>, vector<32x256xbf16>,
    %122 = vector.extract_strided_slice %83 {offsets = [0, 1], sizes = [32, 255], strides = [1, 1]} : vector<32x256xf32> to vector<32x255xf32>
    %123 = vector.extract_strided_slice %83 {offsets = [0, 0], sizes = [32, 1], strides = [1, 1]} : vector<32x256xf32> to vector<32x1xf32>
    %124 = tpu.concatenate %122, %123 in 1 : vector<32x255xf32>, vector<32x1xf32> -> vector<32x256xf32>
    %c5_58 = arith.constant 5 : index
    %c0_59 = arith.constant 0 : index
    %c0_60 = arith.constant 0 : index
    %125 = vector.load %arg5[%c5_58, %c0_59, %c0_60] : memref<9x1x256xf32, #tpu.memory_space<vmem>>, vector<1x1x256xf32>
    %126 = vector.shape_cast %125 : vector<1x1x256xf32> to vector<1x256xf32>
    %127 = vector.broadcast %126 : vector<1x256xf32> to vector<32x256xf32>
    %128 = arith.mulf %124, %127 : vector<32x256xf32>
    %129 = arith.truncf %128 : vector<32x256xf32> to vector<32x256xbf16>
    %c160_61 = arith.constant 160 : index
    %c0_62 = arith.constant 0 : index
    %130 = vector.load %arg7[%c160_61, %c0_62] : memref<288x256xbf16, #tpu.memory_space<vmem>>, vector<32x256xbf16>
    tpu.vector_store %arg7[%c160_61, %c0_62], %129 {strides = array<i32>} : memref<288x256xbf16, #tpu.memory_space<vmem>>, vector<32x256xbf16>,
    %131 = vector.extract_strided_slice %83 {offsets = [0, 15], sizes = [32, 241], strides = [1, 1]} : vector<32x256xf32> to vector<32x241xf32>
    %132 = vector.extract_strided_slice %83 {offsets = [0, 0], sizes = [32, 15], strides = [1, 1]} : vector<32x256xf32> to vector<32x15xf32>
    %133 = tpu.concatenate %131, %132 in 1 : vector<32x241xf32>, vector<32x15xf32> -> vector<32x256xf32>
    %c6_63 = arith.constant 6 : index
    %c0_64 = arith.constant 0 : index
    %c0_65 = arith.constant 0 : index
    %134 = vector.load %arg5[%c6_63, %c0_64, %c0_65] : memref<9x1x256xf32, #tpu.memory_space<vmem>>, vector<1x1x256xf32>
    %135 = vector.shape_cast %134 : vector<1x1x256xf32> to vector<1x256xf32>
    %136 = vector.broadcast %135 : vector<1x256xf32> to vector<32x256xf32>
    %137 = arith.mulf %133, %136 : vector<32x256xf32>
    %138 = arith.truncf %137 : vector<32x256xf32> to vector<32x256xbf16>
    %c192_66 = arith.constant 192 : index
    %c0_67 = arith.constant 0 : index
    %139 = vector.load %arg7[%c192_66, %c0_67] : memref<288x256xbf16, #tpu.memory_space<vmem>>, vector<32x256xbf16>
    tpu.vector_store %arg7[%c192_66, %c0_67], %138 {strides = array<i32>} : memref<288x256xbf16, #tpu.memory_space<vmem>>, vector<32x256xbf16>,
    %140 = vector.extract_strided_slice %83 {offsets = [0, 16], sizes = [32, 240], strides = [1, 1]} : vector<32x256xf32> to vector<32x240xf32>
    %141 = vector.extract_strided_slice %83 {offsets = [0, 0], sizes = [32, 16], strides = [1, 1]} : vector<32x256xf32> to vector<32x16xf32>
    %142 = tpu.concatenate %140, %141 in 1 : vector<32x240xf32>, vector<32x16xf32> -> vector<32x256xf32>
    %c7_68 = arith.constant 7 : index
    %c0_69 = arith.constant 0 : index
    %c0_70 = arith.constant 0 : index
    %143 = vector.load %arg5[%c7_68, %c0_69, %c0_70] : memref<9x1x256xf32, #tpu.memory_space<vmem>>, vector<1x1x256xf32>
    %144 = vector.shape_cast %143 : vector<1x1x256xf32> to vector<1x256xf32>
    %145 = vector.broadcast %144 : vector<1x256xf32> to vector<32x256xf32>
    %146 = arith.mulf %142, %145 : vector<32x256xf32>
    %147 = arith.truncf %146 : vector<32x256xf32> to vector<32x256xbf16>
    %c224_71 = arith.constant 224 : index
    %c0_72 = arith.constant 0 : index
    %148 = vector.load %arg7[%c224_71, %c0_72] : memref<288x256xbf16, #tpu.memory_space<vmem>>, vector<32x256xbf16>
    tpu.vector_store %arg7[%c224_71, %c0_72], %147 {strides = array<i32>} : memref<288x256xbf16, #tpu.memory_space<vmem>>, vector<32x256xbf16>,
    %149 = vector.extract_strided_slice %83 {offsets = [0, 17], sizes = [32, 239], strides = [1, 1]} : vector<32x256xf32> to vector<32x239xf32>
    %150 = vector.extract_strided_slice %83 {offsets = [0, 0], sizes = [32, 17], strides = [1, 1]} : vector<32x256xf32> to vector<32x17xf32>
    %151 = tpu.concatenate %149, %150 in 1 : vector<32x239xf32>, vector<32x17xf32> -> vector<32x256xf32>
    %c8_73 = arith.constant 8 : index
    %c0_74 = arith.constant 0 : index
    %c0_75 = arith.constant 0 : index
    %152 = vector.load %arg5[%c8_73, %c0_74, %c0_75] : memref<9x1x256xf32, #tpu.memory_space<vmem>>, vector<1x1x256xf32>
    %153 = vector.shape_cast %152 : vector<1x1x256xf32> to vector<1x256xf32>
    %154 = vector.broadcast %153 : vector<1x256xf32> to vector<32x256xf32>
    %155 = arith.mulf %151, %154 : vector<32x256xf32>
    %156 = arith.truncf %155 : vector<32x256xf32> to vector<32x256xbf16>
    %c256_76 = arith.constant 256 : index
    %c0_77 = arith.constant 0 : index
    %157 = vector.load %arg7[%c256_76, %c0_77] : memref<288x256xbf16, #tpu.memory_space<vmem>>, vector<32x256xbf16>
    tpu.vector_store %arg7[%c256_76, %c0_77], %156 {strides = array<i32>} : memref<288x256xbf16, #tpu.memory_space<vmem>>, vector<32x256xbf16>,
    %c0_78 = arith.constant 0 : index
    %c0_79 = arith.constant 0 : index
    %158 = vector.load %arg4[%c0_78, %c0_79] : memref<32x288xbf16, #tpu.memory_space<vmem>>, vector<32x288xbf16>
    %c0_80 = arith.constant 0 : index
    %c0_81 = arith.constant 0 : index
    %159 = vector.load %arg7[%c0_80, %c0_81] : memref<288x256xbf16, #tpu.memory_space<vmem>>, vector<288x256xbf16>
    %cst_82 = arith.constant dense<0.000000e+00> : vector<32x256xf32>
    %160 = tpu.matmul %158, %159, %cst_82 {dimension_numbers = #tpu.dot_dimension_numbers<[1], [0], [0], [1], [0, 0, 1, 1], [], []>} : vector<32x288xbf16>, vector<288x256xbf16>, vector<32x256xf32> -> vector<32x256xf32>
    %161 = arith.addf %1, %160 : vector<32x256xf32>
    %c0_83 = arith.constant 0 : index
    %c0_84 = arith.constant 0 : index
    %c0_85 = arith.constant 0 : index
    %162 = vector.load %arg6[%c0_83, %c0_84, %c0_85] : memref<1x32x256xf32, #tpu.memory_space<vmem>>, vector<1x32x256xf32>
    %163 = vector.shape_cast %162 : vector<1x32x256xf32> to vector<32x256xf32>
    %164 = vector.shape_cast %161 : vector<32x256xf32> to vector<1x32x256xf32>
    tpu.vector_store %arg6[%c0_83, %c0_84, %c0_85], %164 {strides = array<i32>} : memref<1x32x256xf32, #tpu.memory_space<vmem>>, vector<1x32x256xf32>,
    return
  }
  func.func @transform_0(%arg0: i32) -> (i32, i32, i32) {
    %c0_i32 = arith.constant 0 : i32
    %c0_i32_0 = arith.constant 0 : i32
    %c0_i32_1 = arith.constant 0 : i32
    return %arg0, %c0_i32, %c0_i32_0 : i32, i32, i32
  }
  func.func @transform_1(%arg0: i32) -> (i32, i32) {
    %c0_i32 = arith.constant 0 : i32
    %c0_i32_0 = arith.constant 0 : i32
    %c0_i32_1 = arith.constant 0 : i32
    return %c0_i32, %c0_i32_0 : i32, i32
  }
  func.func @transform_2(%arg0: i32) -> (i32, i32) {
    %c0_i32 = arith.constant 0 : i32
    %c0_i32_0 = arith.constant 0 : i32
    %c0_i32_1 = arith.constant 0 : i32
    return %c0_i32, %c0_i32_0 : i32, i32
  }
  func.func @transform_3(%arg0: i32) -> (i32, i32) {
    %c0_i32 = arith.constant 0 : i32
    %c0_i32_0 = arith.constant 0 : i32
    %c0_i32_1 = arith.constant 0 : i32
    return %c0_i32, %c0_i32_0 : i32, i32
  }
  func.func @transform_4(%arg0: i32) -> (i32, i32, i32) {
    %c0_i32 = arith.constant 0 : i32
    %c0_i32_0 = arith.constant 0 : i32
    %c0_i32_1 = arith.constant 0 : i32
    %c0_i32_2 = arith.constant 0 : i32
    return %c0_i32, %c0_i32_0, %c0_i32_1 : i32, i32, i32
  }
  func.func @transform_5(%arg0: i32) -> (i32, i32, i32) {
    %c0_i32 = arith.constant 0 : i32
    %c0_i32_0 = arith.constant 0 : i32
    %c0_i32_1 = arith.constant 0 : i32
    return %arg0, %c0_i32, %c0_i32_0 : i32, i32, i32
  }
}

</mosaic_0001>

<bundles_post_ra>
// kernel: residual_block_forward.1
= control target key start
LH: loop header
LB: loop body
LE: loop exit
PB: predicated region body
PF: predicated region fallthrough
CT: control target
= control target key end

     0   :  { %s1938_s18 = smov 0   ;;  %s2626_s0 = inlined_call_operand.vmem [shape: f32[2,32,256], index: 0, kind: input, shape index: {}]   ;;  %s2627_s1 = inlined_call_operand.vmem [shape: bf16[32,288], index: 1, kind: input, shape index: {}]   ;;  %s2628_s2 = inlined_call_operand.vmem [shape: f32[32,1], index: 2, kind: input, shape index: {}]   ;;  %s2629_s3 = inlined_call_operand.vmem [shape: bf16[32,288], index: 3, kind: input, shape index: {}]   ;;  %s2630_s4 = inlined_call_operand.vmem [shape: f32[9,1,256], index: 4, kind: input, shape index: {}]   ;;  %s2631_s5 = inlined_call_operand.vmem [shape: f32[2,32,256], index: 5, kind: output, shape index: {}]  }
   0x1 LB: > { %s1781_s19 = sadd.s32 4294967295, %s1897_s18   ;;  %p1785_p0 = scmp.ge.s32.totalorder %s1897_s18, 1  ;;  %s1897_s18 = sphi %s1938_s18, %s15_s18  }
   0x2   : > { %p187_p1 = scmp.lt.s32.totalorder %s1897_s18, 3 }
   0x4   : > { %p188_p2 = pnand %p1785_p0, %p187_p1 }
   0x5   : > { %p215_p3 = scmp.lt.s32.totalorder (!%p188_p2), %s1781_s19, 1  ;;  %s1899_s24 = smov (!%p188_p2), 17   ;;  %v1869_v8 = vld [vmem:[%s2627_s1 + $0x4] ss:$12 sps:$4 sm:$0xff] (!%p188_p2)   ;;  %v281_v9 = vlaneseq (!%p188_p2)  ;;  %v279_v12 = vld [vmem:[%s2630_s4] sm:$0x3] (!%p188_p2) }
   0x6   : > { %191 = sbr.rel (%p188_p2) target bundleno = 956 (0x3bc), region = 40  ;;  %s1900_s25 = smov (!%p188_p2), 16   ;;  %914 = vmatprep.mubr.bf16.mxu0 (!%p188_p2), %v1869_v8  ;;  %vm262_vm0 = vcmask (!%p188_p2), 138240   ;;  %v1907_v22 = vmov (!%p188_p2), 0   ;;  %v821_v43 = vld [vmem:[%s2628_s2] sm:$0xff] (!%p188_p2)  ;;  %v822_v44 = vld [vmem:[%s2628_s2 + $0x8] sm:$0xff] (!%p188_p2) }
   0x7   : > { %s1901_s26 = smov (!%p188_p2), 15   ;;  %s1902_s27 = smov (!%p188_p2), 1   ;;  %v282_v10 = vshrl.u32 (!%p188_p2), %v281_v9, 7  ;;  %1865 = vset.pattern.permute.xlu0 (!%p188_p2), %v1907_v22  ;;  %1866 = vset.pattern.permute.xlu1 (!%p188_p2), %v1907_v22  ;;  %v1790_v45 = vld [vmem:[%s2630_s4 + $0x2] sm:$0x3] (!%p188_p2)  ;;  %v824_v50 = vld [vmem:[%s2628_s2 + $0x18] sm:$0xff] (!%p188_p2) }
   0x8   : > { %s1903_s28 = smov (!%p188_p2), 127   ;;  %s1904_s29 = smov (!%p188_p2), 113   ;;  %v823_v51 = vld [vmem:[%s2628_s2 + $0x10] sm:$0xff] (!%p188_p2)  ;;  %vm327_vm1 = vcmask (!%p188_p2), 130048   ;;  %vm393_vm2 = vcmask (!%p188_p2), 121856   ;;  %vm459_vm3 = vcmask (!%p188_p2), 7168  }
   0x9   : > { %s1905_s30 = smov (!%p188_p2), 112   ;;  %v2095_v11 = vsub.s32 (!%p188_p2), 1, %v282_v10  ;;  %s1906_s8 = smov (!%p188_p2), 111   ;;  %v2104_v13 = vsub.s32 (!%p188_p2), 0, %v282_v10  ;;  %vm529_vm4 = vcmask (!%p188_p2), 1039360   ;;  %vm595_vm5 = vcmask (!%p188_p2), 924672  }
   0xa   : > { %vm661_vm6 = vcmask (!%p188_p2), 916480   ;;  %vm727_vm7 = vcmask (!%p188_p2), 908288   ;;  %vm875_vm8 = vcmask (!%p188_p2), 261120  }
   0xb   : > { %v288_v16 = vrot.slane (!%p188_p2), %v279_v12, %v2095_v11  ;;  %v284_v18 = vrot.slane (!%p188_p2), %v279_v12, %v2104_v13  ;;  %v350_v52 = vrot.slane (!%p188_p2), %v1790_v45, %v2104_v13  ;;  %v354_v53 = vrot.slane (!%p188_p2), %v1790_v45, %v2095_v11 }
   0xd   : > { %s2633_s19 = smov (!%p215_p3, %s1781_s19), 1 }
   0xe   : > { %s1822_s20 = sshll.u32 %s2633_s19, 6 }
   0xf   : > { %s1954_s23 = scalar_lea.vmem %s2626_s0, %s1822_s20  ;;  %s2605_s21 = scalar_lea.vmem %s2631_s5, %s1822_s20 }
  0x10   : > { %v1957_v0 = vld [vmem:[%s1954_s23 + $0x8] sm:$0xff]  ;;  %v1960_v1 = vld [vmem:[%s1954_s23] sm:$0xff]  ;;  %v1967_v2 = vld [vmem:[%s1954_s23 + $0x18] sm:$0xff] }
  0x11   : > { %238 = vrot.lane.b32.xlu0 %v1957_v0, %s1899_s24  ;;  %254 = vrot.lane.b32.xlu1 %v1960_v1, %s1899_s24  ;;  %v1970_v3 = vld [vmem:[%s1954_s23 + $0x10] sm:$0xff]  ;;  %v1977_v4 = vld [vmem:[%s1954_s23 + $0x28] sm:$0xff] }
  0x12   : > { %v1980_v5 = vld [vmem:[%s1954_s23 + $0x38] sm:$0xff]  ;;  %v1987_v6 = vld [vmem:[%s1954_s23 + $0x20] sm:$0xff]  ;;  %v1990_v7 = vld [vmem:[%s1954_s23 + $0x30] sm:$0xff] }
  0x15   : > { %240 = vrot.lane.b32.xlu0 %v1967_v2, %s1899_s24  ;;  %256 = vrot.lane.b32.xlu1 %v1970_v3, %s1899_s24 }
  0x19   : > { %242 = vrot.lane.b32.xlu0 %v1977_v4, %s1899_s24  ;;  %244 = vrot.lane.b32.xlu1 %v1980_v5, %s1899_s24 }
  0x1d   : > { %258 = vrot.lane.b32.xlu0 %v1987_v6, %s1899_s24  ;;  %260 = vrot.lane.b32.xlu1 %v1990_v7, %s1899_s24 }
  0x21   : > { %307 = vrot.lane.b32.xlu0 %v1957_v0, %s1900_s25  ;;  %309 = vrot.lane.b32.xlu1 %v1967_v2, %s1900_s25 }
  0x25   : > { %319 = vrot.lane.b32.xlu0 %v1960_v1, %s1900_s25  ;;  %321 = vrot.lane.b32.xlu1 %v1970_v3, %s1900_s25 }
  0x29   : > { %311 = vrot.lane.b32.xlu0 %v1977_v4, %s1900_s25  ;;  %313 = vrot.lane.b32.xlu1 %v1980_v5, %s1900_s25 }
  0x2d   : > { %323 = vrot.lane.b32.xlu0 %v1987_v6, %s1900_s25  ;;  %325 = vrot.lane.b32.xlu1 %v1990_v7, %s1900_s25 }
  0x31   : > { %373 = vrot.lane.b32.xlu0 %v1957_v0, %s1901_s26  ;;  %375 = vrot.lane.b32.xlu1 %v1967_v2, %s1901_s26 }
  0x35   : > { %385 = vrot.lane.b32.xlu0 %v1960_v1, %s1901_s26  ;;  %387 = vrot.lane.b32.xlu1 %v1970_v3, %s1901_s26 }
  0x39   : > { %377 = vrot.lane.b32.xlu0 %v1977_v4, %s1901_s26  ;;  %379 = vrot.lane.b32.xlu1 %v1980_v5, %s1901_s26 }
  0x3d   : > { %389 = vrot.lane.b32.xlu0 %v1987_v6, %s1901_s26  ;;  %391 = vrot.lane.b32.xlu1 %v1990_v7, %s1901_s26 }
  0x41   : > { %439 = vrot.lane.b32.xlu0 %v1957_v0, %s1902_s27  ;;  %441 = vrot.lane.b32.xlu1 %v1967_v2, %s1902_s27 }
  0x45   : > { %451 = vrot.lane.b32.xlu0 %v1960_v1, %s1902_s27  ;;  %453 = vrot.lane.b32.xlu1 %v1970_v3, %s1902_s27 }
  0x49   : > { %443 = vrot.lane.b32.xlu0 %v1977_v4, %s1902_s27  ;;  %445 = vrot.lane.b32.xlu1 %v1980_v5, %s1902_s27 }
  0x4d   : > { %455 = vrot.lane.b32.xlu0 %v1987_v6, %s1902_s27  ;;  %457 = vrot.lane.b32.xlu1 %v1990_v7, %s1902_s27 }
  0x51   : > { %513 = vrot.lane.b32.xlu0 %v1960_v1, %s1903_s28  ;;  %515 = vrot.lane.b32.xlu1 %v1957_v0, %s1903_s28 }
  0x55   : > { %517 = vrot.lane.b32.xlu0 %v1970_v3, %s1903_s28  ;;  %519 = vrot.lane.b32.xlu1 %v1967_v2, %s1903_s28 }
  0x59   : > { %521 = vrot.lane.b32.xlu0 %v1987_v6, %s1903_s28  ;;  %523 = vrot.lane.b32.xlu1 %v1977_v4, %s1903_s28 }
  0x5d   : > { %525 = vrot.lane.b32.xlu0 %v1990_v7, %s1903_s28  ;;  %527 = vrot.lane.b32.xlu1 %v1980_v5, %s1903_s28 }
  0x61   : > { %579 = vrot.lane.b32.xlu0 %v1960_v1, %s1904_s29  ;;  %581 = vrot.lane.b32.xlu1 %v1957_v0, %s1904_s29 }
  0x65   : > { %583 = vrot.lane.b32.xlu0 %v1970_v3, %s1904_s29  ;;  %585 = vrot.lane.b32.xlu1 %v1967_v2, %s1904_s29 }
  0x69   : > { %587 = vrot.lane.b32.xlu0 %v1987_v6, %s1904_s29  ;;  %589 = vrot.lane.b32.xlu1 %v1977_v4, %s1904_s29 }
  0x6d   : > { %591 = vrot.lane.b32.xlu0 %v1990_v7, %s1904_s29  ;;  %593 = vrot.lane.b32.xlu1 %v1980_v5, %s1904_s29 }
  0x71   : > { %645 = vrot.lane.b32.xlu0 %v1960_v1, %s1905_s30  ;;  %647 = vrot.lane.b32.xlu1 %v1957_v0, %s1905_s30 }
  0x75   : > { %649 = vrot.lane.b32.xlu0 %v1970_v3, %s1905_s30  ;;  %651 = vrot.lane.b32.xlu1 %v1967_v2, %s1905_s30 }
  0x79   : > { %653 = vrot.lane.b32.xlu0 %v1987_v6, %s1905_s30  ;;  %655 = vrot.lane.b32.xlu1 %v1977_v4, %s1905_s30 }
  0x7d   : > { %657 = vrot.lane.b32.xlu0 %v1990_v7, %s1905_s30  ;;  %659 = vrot.lane.b32.xlu1 %v1980_v5, %s1905_s30 }
  0x81   : > { %711 = vrot.lane.b32.xlu0 %v1960_v1, %s1906_s8  ;;  %713 = vrot.lane.b32.xlu1 %v1957_v0, %s1906_s8 }
  0x83   : > { %v239_v14 = vpop.permute.xlu0 %238  ;;  %v255_v15 = vpop.permute.xlu1 %254 }
  0x84   : > { %v263_v17 = vsel %vm262_vm0, %v255_v15, %v239_v14  ;;  %v275_v19 = vsel %vm262_vm0, %v239_v14, %v255_v15 }
  0x85   : > { %715 = vrot.lane.b32.xlu0 %v1970_v3, %s1906_s8  ;;  %717 = vrot.lane.b32.xlu1 %v1967_v2, %s1906_s8  ;;  %v292_v25 = vmul.f32 %v288_v16, %v263_v17  ;;  %v291_v27 = vmul.f32 %v284_v18, %v275_v19 }
  0x87   : > { %v241_v20 = vpop.permute.xlu0 %240  ;;  %v257_v21 = vpop.permute.xlu1 %256 }
  0x88   : > { %v276_v23 = vsel %vm262_vm0, %v241_v20, %v257_v21  ;;  %v264_v24 = vsel %vm262_vm0, %v257_v21, %v241_v20 }
  0x89   : > { %719 = vrot.lane.b32.xlu0 %v1987_v6, %s1906_s8  ;;  %721 = vrot.lane.b32.xlu1 %v1977_v4, %s1906_s8  ;;  %v294_v26 = vmul.f32 %v288_v16, %v264_v24  ;;  %v293_v28 = vmul.f32 %v284_v18, %v276_v23 }
  0x8b   : > { %v243_v29 = vpop.permute.xlu0 %242  ;;  %v245_v30 = vpop.permute.xlu1 %244  ;;  %v300_v31 = vpack.c.bf16 %v294_v26, %v292_v25  ;;  %v299_v32 = vpack.c.bf16 %v293_v28, %v291_v27  ;;  %v1791_v25 = vld [vmem:[%s2630_s4 + $0x4] sm:$0x3] }
  0x8d   : > { %723 = vrot.lane.b32.xlu0 %v1990_v7, %s1906_s8  ;;  %725 = vrot.lane.b32.xlu1 %v1980_v5, %s1906_s8 }
  0x8e   : > { %882 = vmatprep.subr.bf16.mxu0 %v300_v31  ;;  %v420_v31 = vrot.slane %v1791_v25, %v2095_v11 }
  0x8f   : > { %883 = vmatpush1.bf16.msra.mxu0 %v299_v32  ;;  %v259_v33 = vpop.permute.xlu0 %258  ;;  %v261_v34 = vpop.permute.xlu1 %260 }
  0x90   : > { %v265_v35 = vsel %vm262_vm0, %v259_v33, %v243_v29  ;;  %v277_v36 = vsel %vm262_vm0, %v243_v29, %v259_v33  ;;  %v266_v37 = vsel %vm262_vm0, %v261_v34, %v245_v30  ;;  %v278_v38 = vsel %vm262_vm0, %v245_v30, %v261_v34 }
  0x91   : > { %v295_v39 = vmul.f32 %v284_v18, %v277_v36  ;;  %v296_v40 = vmul.f32 %v288_v16, %v265_v35  ;;  %v297_v41 = vmul.f32 %v284_v18, %v278_v38  ;;  %v298_v42 = vmul.f32 %v288_v16, %v266_v37  ;;  %827 = vperm.xlu0 %1865, %v821_v43  }
  0x92   : > { %832 = vperm.xlu1 %1866, %v822_v44   ;;  %v416_v30 = vrot.slane %v1791_v25, %v2104_v13 }
  0x93   : > { %v308_v46 = vpop.permute.xlu0 %307  ;;  %v310_v47 = vpop.permute.xlu1 %309  ;;  %v302_v48 = vpack.c.bf16 %v298_v42, %v296_v40  ;;  %v301_v49 = vpack.c.bf16 %v297_v41, %v295_v39 }
  0x95   : > { %884 = vmatprep.subr.bf16.mxu0 %v302_v48  ;;  %842 = vperm.xlu0 %1865, %v824_v50  }
  0x96   : > { %885 = vmatpush1.bf16.msra.mxu0 %v301_v49  ;;  %837 = vperm.xlu1 %1866, %v823_v51  }
  0x97   : > { %v320_v54 = vpop.permute.xlu0 %319  ;;  %v322_v55 = vpop.permute.xlu1 %321 }
  0x98   : > { %v328_v56 = vsel %vm327_vm1, %v320_v54, %v308_v46  ;;  %v340_v57 = vsel %vm327_vm1, %v308_v46, %v320_v54  ;;  %v329_v58 = vsel %vm327_vm1, %v322_v55, %v310_v47  ;;  %v341_v59 = vsel %vm327_vm1, %v310_v47, %v322_v55 }
  0x99   : > { %v357_v60 = vmul.f32 %v350_v52, %v340_v57  ;;  %v358_v61 = vmul.f32 %v354_v53, %v328_v56  ;;  %v359_v62 = vmul.f32 %v350_v52, %v341_v59  ;;  %v360_v63 = vmul.f32 %v354_v53, %v329_v58  ;;  %v1792_v56 = vld [vmem:[%s2630_s4 + $0x6] sm:$0x3] }
  0x9b   : > { %v312_v8 = vpop.permute.xlu0 %311  ;;  %v314_v9 = vpop.permute.xlu1 %313  ;;  %v366_v10 = vpack.c.bf16 %v360_v63, %v358_v61  ;;  %v365_v12 = vpack.c.bf16 %v359_v62, %v357_v60  ;;  %v482_v61 = vrot.slane %v1792_v56, %v2104_v13  ;;  %v486_v62 = vrot.slane %v1792_v56, %v2095_v11 }
  0x9d   : > { %886 = vmatprep.subr.bf16.mxu0 %v366_v10 }
  0x9e   : > { %887 = vmatpush1.bf16.msra.mxu0 %v365_v12 }
  0x9f   : > { %v324_v14 = vpop.permute.xlu0 %323  ;;  %v326_v15 = vpop.permute.xlu1 %325 }
  0xa0   : > { %v330_v16 = vsel %vm327_vm1, %v324_v14, %v312_v8  ;;  %v342_v17 = vsel %vm327_vm1, %v312_v8, %v324_v14  ;;  %v331_v18 = vsel %vm327_vm1, %v326_v15, %v314_v9  ;;  %v343_v19 = vsel %vm327_vm1, %v314_v9, %v326_v15 }
  0xa1   : > { %v361_v20 = vmul.f32 %v350_v52, %v342_v17  ;;  %v362_v21 = vmul.f32 %v354_v53, %v330_v16  ;;  %v363_v23 = vmul.f32 %v350_v52, %v343_v19  ;;  %v364_v24 = vmul.f32 %v354_v53, %v331_v18 }
  0xa3   : > { %v374_v26 = vpop.permute.xlu0 %373  ;;  %v376_v27 = vpop.permute.xlu1 %375  ;;  %v368_v28 = vpack.c.bf16 %v364_v24, %v362_v21  ;;  %v367_v29 = vpack.c.bf16 %v363_v23, %v361_v20 }
  0xa5   : > { %888 = vmatprep.subr.bf16.mxu0 %v368_v28 }
  0xa6   : > { %889 = vmatpush1.bf16.msra.mxu0 %v367_v29 }
  0xa7   : > { %v386_v32 = vpop.permute.xlu0 %385  ;;  %v388_v33 = vpop.permute.xlu1 %387 }
  0xa8   : > { %v394_v34 = vsel %vm393_vm2, %v386_v32, %v374_v26  ;;  %v406_v35 = vsel %vm393_vm2, %v374_v26, %v386_v32  ;;  %v395_v36 = vsel %vm393_vm2, %v388_v33, %v376_v27  ;;  %v407_v37 = vsel %vm393_vm2, %v376_v27, %v388_v33 }
  0xa9   : > { %v423_v38 = vmul.f32 %v416_v30, %v406_v35  ;;  %v424_v39 = vmul.f32 %v420_v31, %v394_v34  ;;  %v425_v40 = vmul.f32 %v416_v30, %v407_v37  ;;  %v426_v41 = vmul.f32 %v420_v31, %v395_v36 }
  0xab   : > { %v378_v42 = vpop.permute.xlu0 %377  ;;  %v380_v43 = vpop.permute.xlu1 %379  ;;  %v432_v44 = vpack.c.bf16 %v426_v41, %v424_v39  ;;  %v431_v45 = vpack.c.bf16 %v425_v40, %v423_v38  ;;  %v506_v38 = vpack.c.bf16 %v1967_v2, %v1957_v0  ;;  %v1793_v39 = vld [vmem:[%s2630_s4 + $0xa] sm:$0x3]  ;;  %v505_v40 = vpack.c.bf16 %v1970_v3, %v1960_v1 }
  0xac   : > { %v560_v41 = vrot.slane %v1793_v39, %v2095_v11  ;;  %v507_v1 = vpack.c.bf16 %v1990_v7, %v1987_v6 }
  0xad   : > { %890 = vmatprep.subr.bf16.mxu0 %v432_v44  ;;  %v508_v44 = vpack.c.bf16 %v1980_v5, %v1977_v4 }
  0xae   : > { %891 = vmatpush1.bf16.msra.mxu0 %v431_v45 }
  0xaf   : > { %v390_v46 = vpop.permute.xlu0 %389  ;;  %v392_v47 = vpop.permute.xlu1 %391 }
  0xb0   : > { %v396_v48 = vsel %vm393_vm2, %v390_v46, %v378_v42  ;;  %v408_v49 = vsel %vm393_vm2, %v378_v42, %v390_v46  ;;  %v397_v50 = vsel %vm393_vm2, %v392_v47, %v380_v43  ;;  %v409_v51 = vsel %vm393_vm2, %v380_v43, %v392_v47 }
  0xb1   : > { %v427_v52 = vmul.f32 %v416_v30, %v408_v49  ;;  %v428_v53 = vmul.f32 %v420_v31, %v396_v48  ;;  %v429_v54 = vmul.f32 %v416_v30, %v409_v51  ;;  %v430_v55 = vmul.f32 %v420_v31, %v397_v50 }
  0xb2   : > { %v556_v47 = vrot.slane %v1793_v39, %v2104_v13  ;;  %v1795_v39 = vld [vmem:[%s2630_s4 + $0xe] sm:$0x3] }
  0xb3   : > { %v440_v57 = vpop.permute.xlu0 %439  ;;  %v442_v58 = vpop.permute.xlu1 %441  ;;  %v434_v59 = vpack.c.bf16 %v430_v55, %v428_v53  ;;  %v433_v60 = vpack.c.bf16 %v429_v54, %v427_v52 }
  0xb5   : > { %892 = vmatprep.subr.bf16.mxu0 %v434_v59 }
  0xb6   : > { %893 = vmatpush1.bf16.msra.mxu0 %v433_v60 }
  0xb7   : > { %v452_v63 = vpop.permute.xlu0 %451  ;;  %v454_v8 = vpop.permute.xlu1 %453 }
  0xb8   : > { %v460_v9 = vsel %vm459_vm3, %v452_v63, %v440_v57  ;;  %v472_v10 = vsel %vm459_vm3, %v440_v57, %v452_v63  ;;  %v461_v12 = vsel %vm459_vm3, %v454_v8, %v442_v58  ;;  %v473_v14 = vsel %vm459_vm3, %v442_v58, %v454_v8 }
  0xb9   : > { %v489_v15 = vmul.f32 %v482_v61, %v472_v10  ;;  %v490_v16 = vmul.f32 %v486_v62, %v460_v9  ;;  %v491_v17 = vmul.f32 %v482_v61, %v473_v14  ;;  %v492_v18 = vmul.f32 %v486_v62, %v461_v12 }
  0xbb   : > { %v444_v19 = vpop.permute.xlu0 %443  ;;  %v446_v20 = vpop.permute.xlu1 %445  ;;  %v498_v21 = vpack.c.bf16 %v492_v18, %v490_v16  ;;  %v497_v23 = vpack.c.bf16 %v491_v17, %v489_v15 }
  0xbd   : > { %894 = vmatprep.subr.bf16.mxu0 %v498_v21 }
  0xbe   : > { %895 = vmatpush1.bf16.msra.mxu0 %v497_v23 }
  0xbf   : > { %v456_v24 = vpop.permute.xlu0 %455  ;;  %v458_v25 = vpop.permute.xlu1 %457 }
  0xc0   : > { %v462_v26 = vsel %vm459_vm3, %v456_v24, %v444_v19  ;;  %v474_v27 = vsel %vm459_vm3, %v444_v19, %v456_v24  ;;  %v463_v28 = vsel %vm459_vm3, %v458_v25, %v446_v20  ;;  %v475_v29 = vsel %vm459_vm3, %v446_v20, %v458_v25 }
  0xc1   : > { %v493_v30 = vmul.f32 %v482_v61, %v474_v27  ;;  %v494_v31 = vmul.f32 %v486_v62, %v462_v26  ;;  %v495_v32 = vmul.f32 %v482_v61, %v475_v29  ;;  %v496_v33 = vmul.f32 %v486_v62, %v463_v28  ;;  %v1794_v61 = vld [vmem:[%s2630_s4 + $0xc] sm:$0x3] }
  0xc2   : > { %v622_v10 = vrot.slane %v1794_v61, %v2104_v13  ;;  %v626_v12 = vrot.slane %v1794_v61, %v2095_v11 }
  0xc3   : > { %v514_v34 = vpop.permute.xlu0 %513  ;;  %v516_v35 = vpop.permute.xlu1 %515  ;;  %v500_v36 = vpack.c.bf16 %v496_v33, %v494_v31  ;;  %v499_v37 = vpack.c.bf16 %v495_v32, %v493_v30 }
  0xc4   : > { %v546_v0 = vsel %vm529_vm4, %v516_v35, %v514_v34  ;;  %v530_v3 = vsel %vm529_vm4, %v514_v34, %v516_v35 }
  0xc5   : > { %896 = vmatprep.subr.bf16.mxu0 %v500_v36  ;;  %v564_v48 = vmul.f32 %v560_v41, %v546_v0  ;;  %v563_v51 = vmul.f32 %v556_v47, %v530_v3  ;;  %v692_v0 = vrot.slane %v1795_v39, %v2095_v11 }
  0xc6   : > { %897 = vmatpush1.bf16.msra.mxu0 %v499_v37 }
  0xc7   : > { %v518_v42 = vpop.permute.xlu0 %517  ;;  %v520_v43 = vpop.permute.xlu1 %519  ;;  %898 = vmatprep.subr.bf16.mxu0 %v506_v38 }
  0xc8   : > { %v547_v2 = vsel %vm529_vm4, %v520_v43, %v518_v42  ;;  %v531_v45 = vsel %vm529_vm4, %v518_v42, %v520_v43 }
  0xc9   : > { %v566_v46 = vmul.f32 %v560_v41, %v547_v2  ;;  %v565_v4 = vmul.f32 %v556_v47, %v531_v45 }
  0xca   : > { %899 = vmatpush1.bf16.msra.mxu0 %v505_v40 }
  0xcb   : > { %v522_v49 = vpop.permute.xlu0 %521  ;;  %v524_v50 = vpop.permute.xlu1 %523  ;;  %900 = vmatprep.subr.bf16.mxu0 %v508_v44  ;;  %v572_v5 = vpack.c.bf16 %v566_v46, %v564_v48  ;;  %v571_v7 = vpack.c.bf16 %v565_v4, %v563_v51  ;;  %v688_v44 = vrot.slane %v1795_v39, %v2104_v13 }
  0xcc   : > { %v532_v52 = vsel %vm529_vm4, %v522_v49, %v524_v50  ;;  %v548_v53 = vsel %vm529_vm4, %v524_v50, %v522_v49 }
  0xcd   : > { %v567_v57 = vmul.f32 %v556_v47, %v532_v52  ;;  %v568_v58 = vmul.f32 %v560_v41, %v548_v53 }
  0xce   : > { %901 = vmatpush1.bf16.msra.mxu0 %v507_v1 }
  0xcf   : > { %v526_v54 = vpop.permute.xlu0 %525  ;;  %v528_v55 = vpop.permute.xlu1 %527  ;;  %902 = vmatprep.subr.bf16.mxu0 %v572_v5 }
  0xd0   : > { %v533_v56 = vsel %vm529_vm4, %v526_v54, %v528_v55  ;;  %v549_v6 = vsel %vm529_vm4, %v528_v55, %v526_v54 }
  0xd1   : > { %v569_v59 = vmul.f32 %v556_v47, %v533_v56  ;;  %v570_v60 = vmul.f32 %v560_v41, %v549_v6 }
  0xd2   : > { %903 = vmatpush1.bf16.msra.mxu0 %v571_v7 }
  0xd3   : > { %v580_v62 = vpop.permute.xlu0 %579  ;;  %v582_v63 = vpop.permute.xlu1 %581  ;;  %v574_v8 = vpack.c.bf16 %v570_v60, %v568_v58  ;;  %v573_v9 = vpack.c.bf16 %v569_v59, %v567_v57 }
  0xd4   : > { %v596_v14 = vsel %vm595_vm5, %v580_v62, %v582_v63  ;;  %v612_v15 = vsel %vm595_vm5, %v582_v63, %v580_v62  ;;  %v1796_v62 = vld [vmem:[%s2630_s4 + $0x10] sm:$0x3] }
  0xd5   : > { %904 = vmatprep.subr.bf16.mxu0 %v574_v8  ;;  %v629_v20 = vmul.f32 %v622_v10, %v596_v14  ;;  %v630_v21 = vmul.f32 %v626_v12, %v612_v15  ;;  %v758_v14 = vrot.slane %v1796_v62, %v2095_v11  ;;  %v1867_v15 = vld [vmem:[%s2627_s1] ss:$12 sps:$4 sm:$0xff]  }
  0xd6   : > { %905 = vmatpush1.bf16.msra.mxu0 %v573_v9 }
  0xd7   : > { %v584_v16 = vpop.permute.xlu0 %583  ;;  %v586_v17 = vpop.permute.xlu1 %585 }
  0xd8   : > { %v597_v18 = vsel %vm595_vm5, %v584_v16, %v586_v17  ;;  %v613_v19 = vsel %vm595_vm5, %v586_v17, %v584_v16 }
  0xd9   : > { %v631_v23 = vmul.f32 %v622_v10, %v597_v18  ;;  %v632_v24 = vmul.f32 %v626_v12, %v613_v19  ;;  %v1870_v18 = vld [vmem:[%s2627_s1 + $0x1c] ss:$12 sps:$4 sm:$0xff]  }
  0xdb   : > { %v588_v25 = vpop.permute.xlu0 %587  ;;  %v590_v26 = vpop.permute.xlu1 %589  ;;  %v638_v27 = vpack.c.bf16 %v632_v24, %v630_v21  ;;  %v637_v28 = vpack.c.bf16 %v631_v23, %v629_v20 }
  0xdc   : > { %v598_v29 = vsel %vm595_vm5, %v588_v25, %v590_v26  ;;  %v614_v30 = vsel %vm595_vm5, %v590_v26, %v588_v25 }
  0xdd   : > { %906 = vmatprep.subr.bf16.mxu0 %v638_v27  ;;  %v633_v35 = vmul.f32 %v622_v10, %v598_v29  ;;  %v634_v36 = vmul.f32 %v626_v12, %v614_v30 }
  0xde   : > { %907 = vmatpush1.bf16.msra.mxu0 %v637_v28 }
  0xdf   : > { %v592_v31 = vpop.permute.xlu0 %591  ;;  %v594_v32 = vpop.permute.xlu1 %593 }
  0xe0   : > { %v599_v33 = vsel %vm595_vm5, %v592_v31, %v594_v32  ;;  %v615_v34 = vsel %vm595_vm5, %v594_v32, %v592_v31  ;;  %v1872_v32 = vld [vmem:[%s2627_s1 + $0x18] ss:$12 sps:$4 sm:$0xff]  }
  0xe1   : > { %v635_v37 = vmul.f32 %v622_v10, %v599_v33  ;;  %v636_v38 = vmul.f32 %v626_v12, %v615_v34  ;;  %v754_v12 = vrot.slane %v1796_v62, %v2104_v13 }
  0xe3   : > { %v646_v40 = vpop.permute.xlu0 %645  ;;  %v648_v41 = vpop.permute.xlu1 %647  ;;  %v640_v42 = vpack.c.bf16 %v636_v38, %v634_v36  ;;  %v639_v43 = vpack.c.bf16 %v635_v37, %v633_v35 }
  0xe4   : > { %v662_v2 = vsel %vm661_vm6, %v646_v40, %v648_v41  ;;  %v678_v45 = vsel %vm661_vm6, %v648_v41, %v646_v40 }
  0xe5   : > { %908 = vmatprep.subr.bf16.mxu0 %v640_v42  ;;  %v695_v48 = vmul.f32 %v688_v44, %v662_v2  ;;  %v696_v49 = vmul.f32 %v692_v0, %v678_v45  ;;  %v1874_v2 = vld [vmem:[%s2627_s1 + $0x20] ss:$12 sps:$4 sm:$0xff]  }
  0xe6   : > { %909 = vmatpush1.bf16.msra.mxu0 %v639_v43 }
  0xe7   : > { %v650_v46 = vpop.permute.xlu0 %649  ;;  %v652_v47 = vpop.permute.xlu1 %651 }
  0xe8   : > { %v663_v1 = vsel %vm661_vm6, %v650_v46, %v652_v47  ;;  %v679_v3 = vsel %vm661_vm6, %v652_v47, %v650_v46 }
  0xe9   : > { %v697_v50 = vmul.f32 %v688_v44, %v663_v1  ;;  %v698_v4 = vmul.f32 %v692_v0, %v679_v3 }
  0xeb   : > { %v654_v5 = vpop.permute.xlu0 %653  ;;  %v656_v51 = vpop.permute.xlu1 %655  ;;  %v704_v52 = vpack.c.bf16 %v698_v4, %v696_v49  ;;  %v703_v53 = vpack.c.bf16 %v697_v50, %v695_v48 }
  0xec   : > { %v664_v54 = vsel %vm661_vm6, %v654_v5, %v656_v51  ;;  %v680_v55 = vsel %vm661_vm6, %v656_v51, %v654_v5 }
  0xed   : > { %910 = vmatprep.subr.bf16.mxu0 %v704_v52  ;;  %v699_v58 = vmul.f32 %v688_v44, %v664_v54  ;;  %v700_v59 = vmul.f32 %v692_v0, %v680_v55 }
  0xee   : > { %911 = vmatpush1.bf16.msra.mxu0 %v703_v53 }
  0xef   : > { %v658_v56 = vpop.permute.xlu0 %657  ;;  %v660_v6 = vpop.permute.xlu1 %659 }
  0xf0   : > { %v665_v7 = vsel %vm661_vm6, %v658_v56, %v660_v6  ;;  %v681_v57 = vsel %vm661_vm6, %v660_v6, %v658_v56 }
  0xf1   : > { %v701_v60 = vmul.f32 %v688_v44, %v665_v7  ;;  %v702_v61 = vmul.f32 %v692_v0, %v681_v57  ;;  %v1873_v0 = vld [vmem:[%s2627_s1 + $0x8] ss:$12 sps:$4 sm:$0xff]  }
  0xf3   : > { %v712_v63 = vpop.permute.xlu0 %711  ;;  %v714_v8 = vpop.permute.xlu1 %713  ;;  %v706_v9 = vpack.c.bf16 %v702_v61, %v700_v59  ;;  %v705_v10 = vpack.c.bf16 %v701_v60, %v699_v58 }
  0xf4   : > { %v728_v16 = vsel %vm727_vm7, %v712_v63, %v714_v8  ;;  %v744_v17 = vsel %vm727_vm7, %v714_v8, %v712_v63 }
  0xf5   : > { %912 = vmatprep.subr.bf16.mxu0 %v706_v9  ;;  %v761_v24 = vmul.f32 %v754_v12, %v728_v16  ;;  %v762_v25 = vmul.f32 %v758_v14, %v744_v17 }
  0xf6   : > { %913 = vmatpush1.bf16.msra.mxu0 %v705_v10 }
  0xf7   : > { %v716_v19 = vpop.permute.xlu0 %715  ;;  %v718_v20 = vpop.permute.xlu1 %717 }
  0xf8   : > { %v729_v21 = vsel %vm727_vm7, %v716_v19, %v718_v20  ;;  %v745_v23 = vsel %vm727_vm7, %v718_v20, %v716_v19 }
  0xf9   : > { %v763_v26 = vmul.f32 %v754_v12, %v729_v21  ;;  %v764_v27 = vmul.f32 %v758_v14, %v745_v23  ;;  %915 = vmatmul.mubr.bf16.vlgmr.msra.gmra.mrb[0].mxu0 %v1867_v15  ;;  %v1040_v23 = vld [vmem:[%s2630_s4] sm:$0x3] }
  0xfa   : > { %924 = vmatprep.mubr.bf16.mxu0 %v1870_v18 }
  0xfb   : > { %v769_v28 = vpack.c.bf16 %v763_v26, %v761_v24  ;;  %v720_v29 = vpop.permute.xlu0 %719  ;;  %v722_v30 = vpop.permute.xlu1 %721  ;;  %v770_v31 = vpack.c.bf16 %v764_v27, %v762_v25 }
  0xfc   : > { %v730_v33 = vsel %vm727_vm7, %v720_v29, %v722_v30  ;;  %v746_v34 = vsel %vm727_vm7, %v722_v30, %v720_v29  ;;  %v1049_v29 = vrot.slane %v1040_v23, %v2095_v11 }
  0xfd   : > { %935 = vmatprep.subr.bf16.mxu0 %v770_v31  ;;  %v765_v39 = vmul.f32 %v754_v12, %v730_v33  ;;  %v766_v40 = vmul.f32 %v758_v14, %v746_v34 }
  0xfe   : > { %936 = vmatpush1.bf16.msra.mxu0 %v769_v28  ;;  %v1045_v28 = vrot.slane %v1040_v23, %v2104_v13 }
  0xff   : > { %v724_v35 = vpop.permute.xlu0 %723  ;;  %v726_v36 = vpop.permute.xlu1 %725 }
 0x100   : > { %v731_v37 = vsel %vm727_vm7, %v724_v35, %v726_v36  ;;  %v747_v38 = vsel %vm727_vm7, %v726_v36, %v724_v35 }
 0x101   : > { %v767_v41 = vmul.f32 %v754_v12, %v731_v37  ;;  %v768_v42 = vmul.f32 %v758_v14, %v747_v38  ;;  %925 = vmatmul.mubr.bf16.gmra.mrb[4].mxu0 %v1872_v32  ;;  %v1877_v12 = vld [vmem:[%s2629_s3 + $0x4] ss:$12 sps:$4 sm:$0xff]  }
 0x102   : > { %967 = vmatprep.mubr.bf16.mxu0 %v1907_v22  ;;  %1636 = vmatprep.mubr.bf16.mxu1 %v1877_v12 }
 0x103   : > { %v771_v43 = vpack.c.bf16 %v767_v41, %v765_v39  ;;  %v772_v44 = vpack.c.bf16 %v768_v42, %v766_v40 }
 0x105   : > { %937 = vmatprep.subr.bf16.mxu0 %v772_v44 }
 0x106   : > { %938 = vmatpush1.bf16.msra.mxu0 %v771_v43 }
 0x109   : > { %1803 = vmatmul.mubr.msk.bf16.vlgmr.msra.gmra.mrb[0].mxu0 %vm875_vm8, %v1873_v0 }
 0x10a   : > { %977 = vmatprep.mubr.bf16.mxu0 %v1907_v22 }
 0x110   : > { %v828_v45 = vpop.permute.xlu0 %827 }
 0x111   : > { %1804 = vmatmul.mubr.msk.bf16.gmra.mrb[4].mxu0 %vm875_vm8, %v1874_v2  ;;  %v833_v1 = vpop.permute.xlu1 %832 }
 0x114   : > { %v843_v58 = vpop.permute.xlu0 %842 }
 0x115   : > { %v838_v57 = vpop.permute.xlu1 %837 }
 0x1dc   : > { %v969_v46 = vpop.f32.mrb[0].mxu0 }
 0x1dd   : > { %v1824_v47 = vadd.f32 %v969_v46, %v828_v45  ;;  %v971_v3 = vpop.f32.mrb[1].mxu0 }
 0x1de   : > { %v1825_v48 = vadd.f32 %v971_v3, %v828_v45  ;;  %v973_v49 = vpop.f32.mrb[2].mxu0 }
 0x1df   : > { %v2260_v50 = vmax.f32 %v1824_v47, 0.0  ;;  %v975_v4 = vpop.f32.mrb[3].mxu0  ;;  %v1826_v51 = vadd.f32 %v973_v49, %v833_v1 }
 0x1e0   : > { %v2262_v5 = vmax.f32 %v1825_v48, 0.0  ;;  %v1827_v6 = vadd.f32 %v975_v4, %v833_v1  ;;  %v1805_v4 = vld [vmem:[%s2630_s4 + $0x2] sm:$0x3] }
 0x1e1   : > { %1016 = vrot.lane.b32.xlu1 %v2260_v50, %s1899_s24  ;;  %v2268_v52 = vmax.f32 %v1826_v51, 0.0 }
 0x1e2   : > { %1270 = vrot.lane.b32.xlu0 %v2262_v5, %s1903_s28  ;;  %v2286_v7 = vmax.f32 %v1827_v6, 0.0 }
 0x1e4   : > { %v979_v53 = vpop.f32.mrb[4].mxu0 }
 0x1e5   : > { %v981_v54 = vpop.f32.mrb[5].mxu0  ;;  %1080 = vrot.lane.b32.xlu1 %v2260_v50, %s1900_s25  ;;  %v1828_v59 = vadd.f32 %v979_v53, %v838_v57 }
 0x1e6   : > { %v983_v55 = vpop.f32.mrb[6].mxu0  ;;  %1018 = vrot.lane.b32.xlu0 %v2268_v52, %s1899_s24  ;;  %v1829_v63 = vadd.f32 %v981_v54, %v838_v57  ;;  %v1113_v54 = vrot.slane %v1805_v4, %v2095_v11 }
 0x1e7   : > { %v985_v56 = vpop.f32.mrb[7].mxu0  ;;  %v1830_v60 = vadd.f32 %v983_v55, %v843_v58  ;;  %v2304_v61 = vmax.f32 %v1828_v59, 0.0  ;;  %v1109_v55 = vrot.slane %v1805_v4, %v2104_v13 }
 0x1e8   : > { %v1831_v8 = vadd.f32 %v985_v56, %v843_v58  ;;  %v2324_v9 = vmax.f32 %v1829_v63, 0.0 }
 0x1e9   : > { %1144 = vrot.lane.b32.xlu1 %v2260_v50, %s1901_s26  ;;  %v2306_v62 = vmax.f32 %v1830_v60, 0.0 }
 0x1ea   : > { %1082 = vrot.lane.b32.xlu0 %v2268_v52, %s1900_s25  ;;  %v2326_v10 = vmax.f32 %v1831_v8, 0.0 }
 0x1ed   : > { %1208 = vrot.lane.b32.xlu1 %v2260_v50, %s1902_s27 }
 0x1ee   : > { %1146 = vrot.lane.b32.xlu0 %v2268_v52, %s1901_s26 }
 0x1f1   : > { %1268 = vrot.lane.b32.xlu1 %v2260_v50, %s1903_s28 }
 0x1f2   : > { %1210 = vrot.lane.b32.xlu0 %v2268_v52, %s1902_s27 }
 0x1f5   : > { %1000 = vrot.lane.b32.xlu1 %v2262_v5, %s1899_s24 }
 0x1f6   : > { %1002 = vrot.lane.b32.xlu0 %v2286_v7, %s1899_s24 }
 0x1f9   : > { %1068 = vrot.lane.b32.xlu1 %v2262_v5, %s1900_s25 }
 0x1fa   : > { %1070 = vrot.lane.b32.xlu0 %v2286_v7, %s1900_s25 }
 0x1fd   : > { %1132 = vrot.lane.b32.xlu1 %v2262_v5, %s1901_s26 }
 0x1fe   : > { %1134 = vrot.lane.b32.xlu0 %v2286_v7, %s1901_s26 }
 0x201   : > { %1196 = vrot.lane.b32.xlu1 %v2262_v5, %s1902_s27 }
 0x202   : > { %1198 = vrot.lane.b32.xlu0 %v2286_v7, %s1902_s27 }
 0x205   : > { %1020 = vrot.lane.b32.xlu1 %v2304_v61, %s1899_s24 }
 0x206   : > { %1022 = vrot.lane.b32.xlu0 %v2306_v62, %s1899_s24 }
 0x209   : > { %1084 = vrot.lane.b32.xlu1 %v2304_v61, %s1900_s25 }
 0x20a   : > { %1086 = vrot.lane.b32.xlu0 %v2306_v62, %s1900_s25 }
 0x20d   : > { %1148 = vrot.lane.b32.xlu1 %v2304_v61, %s1901_s26 }
 0x20e   : > { %1150 = vrot.lane.b32.xlu0 %v2306_v62, %s1901_s26 }
 0x211   : > { %1212 = vrot.lane.b32.xlu1 %v2304_v61, %s1902_s27 }
 0x212   : > { %1214 = vrot.lane.b32.xlu0 %v2306_v62, %s1902_s27 }
 0x215   : > { %1004 = vrot.lane.b32.xlu1 %v2324_v9, %s1899_s24 }
 0x216   : > { %1006 = vrot.lane.b32.xlu0 %v2326_v10, %s1899_s24 }
 0x219   : > { %1272 = vrot.lane.b32.xlu1 %v2268_v52, %s1903_s28 }
 0x21a   : > { %1274 = vrot.lane.b32.xlu0 %v2286_v7, %s1903_s28 }
 0x21d   : > { %1072 = vrot.lane.b32.xlu1 %v2324_v9, %s1900_s25 }
 0x21e   : > { %1074 = vrot.lane.b32.xlu0 %v2326_v10, %s1900_s25 }
 0x221   : > { %1136 = vrot.lane.b32.xlu1 %v2324_v9, %s1901_s26 }
 0x222   : > { %1278 = vrot.lane.b32.xlu0 %v2324_v9, %s1903_s28 }
 0x225   : > { %1200 = vrot.lane.b32.xlu1 %v2324_v9, %s1902_s27 }
 0x226   : > { %1138 = vrot.lane.b32.xlu0 %v2326_v10, %s1901_s26 }
 0x229   : > { %1276 = vrot.lane.b32.xlu1 %v2304_v61, %s1903_s28 }
 0x22a   : > { %1334 = vrot.lane.b32.xlu0 %v2262_v5, %s1904_s29 }
 0x22d   : > { %1280 = vrot.lane.b32.xlu1 %v2306_v62, %s1903_s28 }
 0x22e   : > { %1202 = vrot.lane.b32.xlu0 %v2326_v10, %s1902_s27 }
 0x231   : > { %1332 = vrot.lane.b32.xlu1 %v2260_v50, %s1904_s29 }
 0x232   : > { %1338 = vrot.lane.b32.xlu0 %v2286_v7, %s1904_s29 }
 0x235   : > { %1336 = vrot.lane.b32.xlu1 %v2268_v52, %s1904_s29 }
 0x236   : > { %1342 = vrot.lane.b32.xlu0 %v2324_v9, %s1904_s29 }
 0x239   : > { %1340 = vrot.lane.b32.xlu1 %v2304_v61, %s1904_s29 }
 0x23a   : > { %1398 = vrot.lane.b32.xlu0 %v2262_v5, %s1905_s30 }
 0x23d   : > { %1344 = vrot.lane.b32.xlu1 %v2306_v62, %s1904_s29 }
 0x23e   : > { %1282 = vrot.lane.b32.xlu0 %v2326_v10, %s1903_s28 }
 0x241   : > { %1396 = vrot.lane.b32.xlu1 %v2260_v50, %s1905_s30 }
 0x242   : > { %1402 = vrot.lane.b32.xlu0 %v2286_v7, %s1905_s30 }
 0x245   : > { %1400 = vrot.lane.b32.xlu1 %v2268_v52, %s1905_s30 }
 0x246   : > { %1346 = vrot.lane.b32.xlu0 %v2326_v10, %s1904_s29 }
 0x249   : > { %1404 = vrot.lane.b32.xlu1 %v2304_v61, %s1905_s30 }
 0x24a   : > { %1406 = vrot.lane.b32.xlu0 %v2324_v9, %s1905_s30 }
 0x24d   : > { %1408 = vrot.lane.b32.xlu1 %v2306_v62, %s1905_s30 }
 0x24e   : > { %1410 = vrot.lane.b32.xlu0 %v2326_v10, %s1905_s30 }
 0x251   : > { %1460 = vrot.lane.b32.xlu1 %v2260_v50, %s1906_s8 }
 0x252   : > { %1462 = vrot.lane.b32.xlu0 %v2262_v5, %s1906_s8 }
 0x253   : > { %v1017_v14 = vpop.permute.xlu1 %1016 }
 0x254   : > { %v1271_v15 = vpop.permute.xlu0 %1270 }
 0x255   : > { %1464 = vrot.lane.b32.xlu1 %v2268_v52, %s1906_s8 }
 0x256   : > { %1466 = vrot.lane.b32.xlu0 %v2286_v7, %s1906_s8 }
 0x257   : > { %v1081_v16 = vpop.permute.xlu1 %1080 }
 0x258   : > { %v1019_v17 = vpop.permute.xlu0 %1018 }
 0x259   : > { %1468 = vrot.lane.b32.xlu1 %v2304_v61, %s1906_s8 }
 0x25a   : > { %1470 = vrot.lane.b32.xlu0 %v2324_v9, %s1906_s8 }
 0x25b   : > { %v2403_v18 = vpop.permute.xlu1 %1144 }
 0x25c   : > { %v1083_v19 = vpop.permute.xlu0 %1082 }
 0x25d   : > { %1472 = vrot.lane.b32.xlu1 %v2306_v62, %s1906_s8 }
 0x25e   : > { %1474 = vrot.lane.b32.xlu0 %v2326_v10, %s1906_s8 }
 0x25f   : > { %v2409_v20 = vpop.permute.xlu1 %1208 }
 0x260   : > { %v2411_v21 = vpop.permute.xlu0 %1146 }
 0x263   : > { %v1269_v24 = vpop.permute.xlu1 %1268 }
 0x264   : > { %v2417_v25 = vsel %vm529_vm4, %v1269_v24, %v1271_v15  ;;  %v2420_v26 = vsel %vm529_vm4, %v1271_v15, %v1269_v24  ;;  %v2422_v27 = vpop.permute.xlu0 %1210 }
 0x267   : > { %v1001_v30 = vpop.permute.xlu1 %1000 }
 0x268   : > { %v1024_v31 = vsel %vm262_vm0, %v1017_v14, %v1001_v30  ;;  %v1036_v32 = vsel %vm262_vm0, %v1001_v30, %v1017_v14  ;;  %v1003_v33 = vpop.permute.xlu0 %1002 }
 0x269   : > { %v1052_v34 = vmul.f32 %v1045_v28, %v1036_v32  ;;  %v1025_v35 = vsel %vm262_vm0, %v1019_v17, %v1003_v33  ;;  %v1037_v36 = vsel %vm262_vm0, %v1003_v33, %v1019_v17  ;;  %v1053_v37 = vmul.f32 %v1049_v29, %v1024_v31 }
 0x26a   : > { %v1054_v38 = vmul.f32 %v1045_v28, %v1037_v36  ;;  %v1055_v39 = vmul.f32 %v1049_v29, %v1025_v35 }
 0x26b   : > { %v1069_v40 = vpop.permute.xlu1 %1068 }
 0x26c   : > { %v1071_v41 = vpop.permute.xlu0 %1070  ;;  %v1061_v42 = vpack.c.bf16 %v1055_v39, %v1053_v37  ;;  %v1060_v43 = vpack.c.bf16 %v1054_v38, %v1052_v34  ;;  %v1088_v56 = vsel %vm327_vm1, %v1081_v16, %v1069_v40  ;;  %v1100_v58 = vsel %vm327_vm1, %v1069_v40, %v1081_v16  ;;  %v1806_v16 = vld [vmem:[%s2630_s4 + $0x4] sm:$0x3] }
 0x26d   : > { %v1089_v6 = vsel %vm327_vm1, %v1083_v19, %v1071_v41  ;;  %v1101_v59 = vsel %vm327_vm1, %v1071_v41, %v1083_v19  ;;  %v1117_v23 = vmul.f32 %v1113_v54, %v1088_v56  ;;  %v1116_v32 = vmul.f32 %v1109_v55, %v1100_v58 }
 0x26e   : > { %1604 = vmatprep.subr.bf16.mxu1 %v1061_v42  ;;  %v1119_v24 = vmul.f32 %v1113_v54, %v1089_v6  ;;  %v1118_v33 = vmul.f32 %v1109_v55, %v1101_v59  ;;  %v1177_v37 = vrot.slane %v1806_v16, %v2095_v11  ;;  %v1173_v39 = vrot.slane %v1806_v16, %v2104_v13 }
 0x26f   : > { %1605 = vmatpush1.bf16.msra.mxu1 %v1060_v43  ;;  %v1133_v44 = vpop.permute.xlu1 %1132  ;;  %v1807_v43 = vld [vmem:[%s2630_s4 + $0x6] sm:$0x3] }
 0x270   : > { %v1135_v0 = vpop.permute.xlu0 %1134  ;;  %v1125_v38 = vpack.c.bf16 %v1119_v24, %v1117_v23  ;;  %v1124_v56 = vpack.c.bf16 %v1118_v33, %v1116_v32 }
 0x271   : > { %v1153_v40 = vsel %vm393_vm2, %v2411_v21, %v1135_v0  ;;  %v1165_v42 = vsel %vm393_vm2, %v1135_v0, %v2411_v21 }
 0x272   : > { %v1183_v59 = vmul.f32 %v1177_v37, %v1153_v40 }
 0x273   : > { %v2430_v2 = vpop.permute.xlu1 %1196 }
 0x274   : > { %v2432_v45 = vpop.permute.xlu0 %1198 }
 0x277   : > { %v1021_v46 = vpop.permute.xlu1 %1020 }
 0x278   : > { %v1023_v47 = vpop.permute.xlu0 %1022 }
 0x27b   : > { %v1085_v1 = vpop.permute.xlu1 %1084 }
 0x27c   : > { %v1087_v3 = vpop.permute.xlu0 %1086 }
 0x27f   : > { %v2434_v48 = vpop.permute.xlu1 %1148 }
 0x280   : > { %v2436_v49 = vpop.permute.xlu0 %1150 }
 0x283   : > { %v2441_v51 = vpop.permute.xlu1 %1212 }
 0x284   : > { %v2443_v53 = vpop.permute.xlu0 %1214 }
 0x287   : > { %v1005_v57 = vpop.permute.xlu1 %1004 }
 0x288   : > { %v1026_v60 = vsel %vm262_vm0, %v1021_v46, %v1005_v57  ;;  %v1038_v63 = vsel %vm262_vm0, %v1005_v57, %v1021_v46  ;;  %v1007_v8 = vpop.permute.xlu0 %1006 }
 0x289   : > { %v1056_v12 = vmul.f32 %v1045_v28, %v1038_v63  ;;  %v1057_v14 = vmul.f32 %v1049_v29, %v1026_v60  ;;  %v1027_v15 = vsel %vm262_vm0, %v1023_v47, %v1007_v8  ;;  %v1039_v17 = vsel %vm262_vm0, %v1007_v8, %v1023_v47 }
 0x28a   : > { %v1058_v30 = vmul.f32 %v1045_v28, %v1039_v17  ;;  %v1059_v31 = vmul.f32 %v1049_v29, %v1027_v15  ;;  %v1152_v28 = vsel %vm393_vm2, %v2403_v18, %v1133_v44  ;;  %v1164_v29 = vsel %vm393_vm2, %v1133_v44, %v2403_v18 }
 0x28b   : > { %v2458_v19 = vpop.permute.xlu1 %1272  ;;  %v1181_v58 = vmul.f32 %v1177_v37, %v1152_v28  ;;  %v1241_v60 = vrot.slane %v1807_v43, %v2095_v11  ;;  %v1180_v8 = vmul.f32 %v1173_v39, %v1164_v29  ;;  %v1216_v17 = vsel %vm459_vm3, %v2409_v20, %v2430_v2 }
 0x28c   : > { %v2460_v34 = vpop.permute.xlu0 %1274  ;;  %v1063_v35 = vpack.c.bf16 %v1059_v31, %v1057_v14  ;;  %v1062_v36 = vpack.c.bf16 %v1058_v30, %v1056_v12  ;;  %v1182_v12 = vmul.f32 %v1173_v39, %v1165_v42  ;;  %v1237_v30 = vrot.slane %v1807_v43, %v2104_v13 }
 0x28d   : > { %v1228_v31 = vsel %vm459_vm3, %v2430_v2, %v2409_v20  ;;  %v1245_v16 = vmul.f32 %v1241_v60, %v1216_v17  ;;  %v1260_v17 = vpack.c.bf16 %v2268_v52, %v2260_v50  ;;  %v1809_v50 = vld [vmem:[%s2630_s4 + $0xc] sm:$0x3]  ;;  %v1262_v52 = vpack.c.bf16 %v2306_v62, %v2304_v61 }
 0x28e   : > { %1606 = vmatprep.subr.bf16.mxu1 %v1063_v35  ;;  %v1188_v33 = vpack.c.bf16 %v1182_v12, %v1180_v8  ;;  %v1229_v35 = vsel %vm459_vm3, %v2432_v45, %v2422_v27  ;;  %v1261_v8 = vpack.c.bf16 %v2286_v7, %v2262_v5  ;;  %v1263_v7 = vpack.c.bf16 %v2326_v10, %v2324_v9 }
 0x28f   : > { %1607 = vmatpush1.bf16.msra.mxu1 %v1062_v36  ;;  %v1073_v41 = vpop.permute.xlu1 %1072 }
 0x290   : > { %v1090_v46 = vsel %vm327_vm1, %v1085_v1, %v1073_v41  ;;  %v1102_v47 = vsel %vm327_vm1, %v1073_v41, %v1085_v1  ;;  %v1075_v4 = vpop.permute.xlu0 %1074  ;;  %1608 = vmatprep.subr.bf16.mxu1 %v1125_v38 }
 0x291   : > { %v1120_v18 = vmul.f32 %v1109_v55, %v1102_v47  ;;  %v1121_v44 = vmul.f32 %v1113_v54, %v1090_v46  ;;  %v1091_v6 = vsel %vm327_vm1, %v1087_v3, %v1075_v4  ;;  %v1103_v57 = vsel %vm327_vm1, %v1075_v4, %v1087_v3 }
 0x292   : > { %v1122_v21 = vmul.f32 %v1109_v55, %v1103_v57  ;;  %v1123_v0 = vmul.f32 %v1113_v54, %v1091_v6  ;;  %v1217_v3 = vsel %vm459_vm3, %v2422_v27, %v2432_v45  ;;  %v1189_v54 = vpack.c.bf16 %v1183_v59, %v1181_v58 }
 0x293   : > { %1609 = vmatpush1.bf16.msra.mxu1 %v1124_v56  ;;  %v1137_v63 = vpop.permute.xlu1 %1136  ;;  %v1247_v36 = vmul.f32 %v1241_v60, %v1217_v3  ;;  %v1244_v46 = vmul.f32 %v1237_v30, %v1228_v31  ;;  %v1246_v47 = vmul.f32 %v1237_v30, %v1229_v35 }
 0x294   : > { %v2480_v1 = vpop.permute.xlu0 %1278  ;;  %v1127_v14 = vpack.c.bf16 %v1123_v0, %v1121_v44  ;;  %v1126_v15 = vpack.c.bf16 %v1122_v21, %v1120_v18  ;;  %v1154_v55 = vsel %vm393_vm2, %v2434_v48, %v1137_v63  ;;  %v1166_v23 = vsel %vm393_vm2, %v1137_v63, %v2434_v48  ;;  %v1808_v63 = vld [vmem:[%s2630_s4 + $0xa] sm:$0x3] }
 0x295   : > { %v1184_v28 = vmul.f32 %v1173_v39, %v1166_v23  ;;  %v1185_v29 = vmul.f32 %v1177_v37, %v1154_v55  ;;  %v1253_v27 = vpack.c.bf16 %v1247_v36, %v1245_v16  ;;  %v1252_v18 = vpack.c.bf16 %v1246_v47, %v1244_v46 }
 0x296   : > { %1610 = vmatprep.subr.bf16.mxu1 %v1127_v14  ;;  %v1309_v3 = vrot.slane %v1808_v63, %v2104_v13  ;;  %v1373_v16 = vrot.slane %v1809_v50, %v2104_v13 }
 0x297   : > { %1611 = vmatpush1.bf16.msra.mxu1 %v1126_v15  ;;  %v1201_v24 = vpop.permute.xlu1 %1200  ;;  %v1285_v15 = vsel %vm529_vm4, %v2458_v19, %v2460_v34 }
 0x298   : > { %v1139_v32 = vpop.permute.xlu0 %1138  ;;  %1612 = vmatprep.subr.bf16.mxu1 %v1189_v54  ;;  %v1218_v45 = vsel %vm459_vm3, %v2441_v51, %v1201_v24  ;;  %v1318_v23 = vmul.f32 %v1309_v3, %v1285_v15 }
 0x299   : > { %v1155_v48 = vsel %vm393_vm2, %v2436_v49, %v1139_v32  ;;  %v1167_v38 = vsel %vm393_vm2, %v1139_v32, %v2436_v49  ;;  %v1230_v49 = vsel %vm459_vm3, %v1201_v24, %v2441_v51  ;;  %v1249_v6 = vmul.f32 %v1241_v60, %v1218_v45 }
 0x29a   : > { %v1186_v40 = vmul.f32 %v1173_v39, %v1167_v38  ;;  %v1187_v41 = vmul.f32 %v1177_v37, %v1155_v48  ;;  %v1248_v44 = vmul.f32 %v1237_v30, %v1230_v49  ;;  %v1377_v32 = vrot.slane %v1809_v50, %v2095_v11 }
 0x29b   : > { %1613 = vmatpush1.bf16.msra.mxu1 %v1188_v33  ;;  %v1277_v20 = vpop.permute.xlu1 %1276 }
 0x29c   : > { %v2503_v2 = vpop.permute.xlu0 %1334  ;;  %v1191_v42 = vpack.c.bf16 %v1187_v41, %v1185_v29  ;;  %v1190_v43 = vpack.c.bf16 %v1186_v40, %v1184_v28  ;;  %v1302_v10 = vsel %vm529_vm4, %v2480_v1, %v1277_v20 }
 0x29e   : > { %1614 = vmatprep.subr.bf16.mxu1 %v1191_v42 }
 0x29f   : > { %1615 = vmatpush1.bf16.msra.mxu1 %v1190_v43  ;;  %v1281_v4 = vpop.permute.xlu1 %1280 }
 0x2a0   : > { %v1203_v39 = vpop.permute.xlu0 %1202  ;;  %1616 = vmatprep.subr.bf16.mxu1 %v1253_v27  ;;  %v1810_v27 = vld [vmem:[%s2630_s4 + $0xe] sm:$0x3] }
 0x2a1   : > { %v1219_v37 = vsel %vm459_vm3, %v2443_v53, %v1203_v39  ;;  %v1231_v56 = vsel %vm459_vm3, %v1203_v39, %v2443_v53  ;;  %v1301_v53 = vsel %vm529_vm4, %v2460_v34, %v2458_v19  ;;  %v1316_v19 = vmul.f32 %v1309_v3, %v2417_v25 }
 0x2a2   : > { %v1250_v57 = vmul.f32 %v1237_v30, %v1231_v56  ;;  %v1251_v58 = vmul.f32 %v1241_v60, %v1219_v37  ;;  %v1313_v60 = vrot.slane %v1808_v63, %v2095_v11  ;;  %v1286_v30 = vsel %vm529_vm4, %v1277_v20, %v2480_v1 }
 0x2a3   : > { %1617 = vmatpush1.bf16.msra.mxu1 %v1252_v18  ;;  %v1333_v59 = vpop.permute.xlu1 %1332  ;;  %v1320_v31 = vmul.f32 %v1309_v3, %v1286_v30  ;;  %v1324_v35 = vpack.c.bf16 %v1318_v23, %v1316_v19  ;;  %v1441_v37 = vrot.slane %v1810_v27, %v2095_v11 }
 0x2a4   : > { %v1339_v21 = vpop.permute.xlu0 %1338  ;;  %v1255_v0 = vpack.c.bf16 %v1251_v58, %v1249_v6  ;;  %v1254_v51 = vpack.c.bf16 %v1250_v57, %v1248_v44  ;;  %v1319_v5 = vmul.f32 %v1313_v60, %v1301_v53  ;;  %v1317_v55 = vmul.f32 %v1313_v60, %v2420_v26 }
 0x2a5   : > { %v1364_v61 = vsel %vm595_vm5, %v2503_v2, %v1333_v59  ;;  %v1321_v36 = vmul.f32 %v1313_v60, %v1302_v10  ;;  %v1348_v29 = vsel %vm595_vm5, %v1333_v59, %v2503_v2 }
 0x2a6   : > { %1618 = vmatprep.subr.bf16.mxu1 %v1255_v0  ;;  %v1325_v9 = vpack.c.bf16 %v1319_v5, %v1317_v55  ;;  %v1381_v41 = vmul.f32 %v1377_v32, %v1364_v61  ;;  %v1380_v45 = vmul.f32 %v1373_v16, %v1348_v29 }
 0x2a7   : > { %1619 = vmatpush1.bf16.msra.mxu1 %v1254_v51  ;;  %v1337_v12 = vpop.permute.xlu1 %1336 }
 0x2a8   : > { %v1343_v14 = vpop.permute.xlu0 %1342  ;;  %1620 = vmatprep.subr.bf16.mxu1 %v1261_v8  ;;  %v1365_v26 = vsel %vm595_vm5, %v1339_v21, %v1337_v12  ;;  %v1349_v62 = vsel %vm595_vm5, %v1337_v12, %v1339_v21  ;;  %v1437_v8 = vrot.slane %v1810_v27, %v2104_v13 }
 0x2a9   : > { %v1383_v48 = vmul.f32 %v1377_v32, %v1365_v26  ;;  %v1382_v20 = vmul.f32 %v1373_v16, %v1349_v62  ;;  %v1875_v62 = vld [vmem:[%s2629_s3] ss:$12 sps:$4 sm:$0xff]  }
 0x2ab   : > { %v1341_v54 = vpop.permute.xlu1 %1340  ;;  %1621 = vmatpush1.bf16.msra.mxu1 %v1260_v17  ;;  %v1388_v44 = vpack.c.bf16 %v1382_v20, %v1380_v45 }
 0x2ac   : > { %v1399_v24 = vpop.permute.xlu0 %1398  ;;  %1622 = vmatprep.subr.bf16.mxu1 %v1263_v7  ;;  %v1350_v47 = vsel %vm595_vm5, %v1341_v54, %v1343_v14  ;;  %v1366_v49 = vsel %vm595_vm5, %v1343_v14, %v1341_v54 }
 0x2ad   : > { %v1384_v2 = vmul.f32 %v1373_v16, %v1350_v47  ;;  %v1385_v6 = vmul.f32 %v1377_v32, %v1366_v49  ;;  %v1880_v47 = vld [vmem:[%s2629_s3 + $0x18] ss:$12 sps:$4 sm:$0xff]  }
 0x2af   : > { %v1345_v34 = vpop.permute.xlu1 %1344  ;;  %1623 = vmatpush1.bf16.msra.mxu1 %v1262_v52 }
 0x2b0   : > { %v1283_v33 = vpop.permute.xlu0 %1282  ;;  %1624 = vmatprep.subr.bf16.mxu1 %v1325_v9 }
 0x2b1   : > { %v1287_v25 = vsel %vm529_vm4, %v1281_v4, %v1283_v33  ;;  %v1303_v1 = vsel %vm529_vm4, %v1283_v33, %v1281_v4  ;;  %v1389_v4 = vpack.c.bf16 %v1383_v48, %v1381_v41  ;;  %v1878_v48 = vld [vmem:[%s2629_s3 + $0x1c] ss:$12 sps:$4 sm:$0xff]  }
 0x2b2   : > { %v1322_v38 = vmul.f32 %v1309_v3, %v1287_v25  ;;  %v1323_v28 = vmul.f32 %v1313_v60, %v1303_v1 }
 0x2b3   : > { %v1397_v40 = vpop.permute.xlu1 %1396  ;;  %1625 = vmatpush1.bf16.msra.mxu1 %v1324_v35 }
 0x2b4   : > { %v1403_v42 = vpop.permute.xlu0 %1402  ;;  %v1327_v43 = vpack.c.bf16 %v1323_v28, %v1321_v36  ;;  %v1326_v46 = vpack.c.bf16 %v1322_v38, %v1320_v31  ;;  %v1428_v57 = vsel %vm661_vm6, %v1399_v24, %v1397_v40  ;;  %v1412_v12 = vsel %vm661_vm6, %v1397_v40, %v1399_v24  ;;  %v1811_v31 = vld [vmem:[%s2630_s4 + $0x10] sm:$0x3] }
 0x2b5   : > { %v1445_v60 = vmul.f32 %v1441_v37, %v1428_v57  ;;  %v1444_v7 = vmul.f32 %v1437_v8, %v1412_v12  ;;  %v1501_v35 = vrot.slane %v1811_v31, %v2104_v13  ;;  %v1505_v61 = vrot.slane %v1811_v31, %v2095_v11  ;;  %v1885_v12 = vld [vmem:[%s1954_s23 + $0x10] sm:$0xff] }
 0x2b6   : > { %1626 = vmatprep.subr.bf16.mxu1 %v1327_v43 }
 0x2b7   : > { %v1401_v39 = vpop.permute.xlu1 %1400  ;;  %1627 = vmatpush1.bf16.msra.mxu1 %v1326_v46 }
 0x2b8   : > { %v1429_v56 = vsel %vm661_vm6, %v1403_v42, %v1401_v39  ;;  %v1347_v18 = vpop.permute.xlu0 %1346  ;;  %1628 = vmatprep.subr.bf16.mxu1 %v1389_v4  ;;  %v1413_v21 = vsel %vm661_vm6, %v1401_v39, %v1403_v42 }
 0x2b9   : > { %v1351_v58 = vsel %vm595_vm5, %v1345_v34, %v1347_v18  ;;  %v1367_v59 = vsel %vm595_vm5, %v1347_v18, %v1345_v34  ;;  %v1447_v0 = vmul.f32 %v1441_v37, %v1429_v56  ;;  %v1446_v3 = vmul.f32 %v1437_v8, %v1413_v21 }
 0x2ba   : > { %v1386_v51 = vmul.f32 %v1373_v16, %v1351_v58  ;;  %v1387_v63 = vmul.f32 %v1377_v32, %v1367_v59  ;;  %v1881_v58 = vld [vmem:[%s2629_s3 + $0x8] ss:$12 sps:$4 sm:$0xff]   ;;  %v1882_v59 = vld [vmem:[%s2629_s3 + $0x20] ss:$12 sps:$4 sm:$0xff]  }
 0x2bb   : > { %v1405_v53 = vpop.permute.xlu1 %1404  ;;  %1629 = vmatpush1.bf16.msra.mxu1 %v1388_v44  ;;  %v1453_v5 = vpack.c.bf16 %v1447_v0, %v1445_v60  ;;  %v1452_v52 = vpack.c.bf16 %v1446_v3, %v1444_v7  ;;  %v1883_v0 = vld [vmem:[%s1954_s23] sm:$0xff] }
 0x2bc   : > { %v1407_v14 = vpop.permute.xlu0 %1406  ;;  %v1391_v15 = vpack.c.bf16 %v1387_v63, %v1385_v6  ;;  %v1390_v17 = vpack.c.bf16 %v1386_v51, %v1384_v2  ;;  %v1884_v63 = vld [vmem:[%s1954_s23 + $0x8] sm:$0xff] }
 0x2bd   : > { %v1414_v54 = vsel %vm661_vm6, %v1405_v53, %v1407_v14  ;;  %v1430_v55 = vsel %vm661_vm6, %v1407_v14, %v1405_v53 }
 0x2be   : > { %1630 = vmatprep.subr.bf16.mxu1 %v1391_v15  ;;  %v1448_v19 = vmul.f32 %v1437_v8, %v1414_v54  ;;  %v1449_v9 = vmul.f32 %v1441_v37, %v1430_v55  ;;  %v1886_v15 = vld [vmem:[%s1954_s23 + $0x18] sm:$0xff]  ;;  %v1888_v55 = vld [vmem:[%s1954_s23 + $0x28] sm:$0xff] }
 0x2bf   : > { %v1409_v23 = vpop.permute.xlu1 %1408  ;;  %1631 = vmatpush1.bf16.msra.mxu1 %v1390_v17 }
 0x2c0   : > { %v1411_v30 = vpop.permute.xlu0 %1410  ;;  %1632 = vmatprep.subr.bf16.mxu1 %v1453_v5  ;;  %v1887_v5 = vld [vmem:[%s1954_s23 + $0x20] sm:$0xff] }
 0x2c1   : > { %v1415_v50 = vsel %vm661_vm6, %v1409_v23, %v1411_v30  ;;  %v1431_v24 = vsel %vm661_vm6, %v1411_v30, %v1409_v23 }
 0x2c2   : > { %v1450_v10 = vmul.f32 %v1437_v8, %v1415_v50  ;;  %v1451_v26 = vmul.f32 %v1441_v37, %v1431_v24  ;;  %v1889_v50 = vld [vmem:[%s1954_s23 + $0x30] sm:$0xff] }
 0x2c3   : > { %v1461_v34 = vpop.permute.xlu1 %1460  ;;  %1633 = vmatpush1.bf16.msra.mxu1 %v1452_v52 }
 0x2c4   : > { %v1463_v16 = vpop.permute.xlu0 %1462  ;;  %v1455_v32 = vpack.c.bf16 %v1451_v26, %v1449_v9  ;;  %v1454_v33 = vpack.c.bf16 %v1450_v10, %v1448_v19  ;;  %v1890_v19 = vld [vmem:[%s1954_s23 + $0x38] sm:$0xff] }
 0x2c5   : > { %v1476_v25 = vsel %vm727_vm7, %v1461_v34, %v1463_v16  ;;  %v1492_v1 = vsel %vm727_vm7, %v1463_v16, %v1461_v34 }
 0x2c6   : > { %1634 = vmatprep.subr.bf16.mxu1 %v1455_v32  ;;  %v1508_v28 = vmul.f32 %v1501_v35, %v1476_v25  ;;  %v1509_v29 = vmul.f32 %v1505_v61, %v1492_v1 }
 0x2c7   : > { %v1465_v36 = vpop.permute.xlu1 %1464  ;;  %1635 = vmatpush1.bf16.msra.mxu1 %v1454_v33 }
 0x2c8   : > { %v1467_v38 = vpop.permute.xlu0 %1466 }
 0x2c9   : > { %v1477_v13 = vsel %vm727_vm7, %v1465_v36, %v1467_v38  ;;  %v1493_v11 = vsel %vm727_vm7, %v1467_v38, %v1465_v36 }
 0x2ca   : > { %v1510_v40 = vmul.f32 %v1501_v35, %v1477_v13  ;;  %v1511_v41 = vmul.f32 %v1505_v61, %v1493_v11  ;;  %1637 = vmatmul.mubr.bf16.vlgmr.msra.gmra.mrb[0].mxu1 %v1875_v62 }
 0x2cb   : > { %v1469_v20 = vpop.permute.xlu1 %1468  ;;  %1646 = vmatprep.mubr.bf16.mxu1 %v1878_v48 }
 0x2cc   : > { %v1516_v42 = vpack.c.bf16 %v1510_v40, %v1508_v28  ;;  %v1471_v43 = vpop.permute.xlu0 %1470  ;;  %v1517_v46 = vpack.c.bf16 %v1511_v41, %v1509_v29 }
 0x2cd   : > { %v1478_v27 = vsel %vm727_vm7, %v1469_v20, %v1471_v43  ;;  %v1494_v45 = vsel %vm727_vm7, %v1471_v43, %v1469_v20 }
 0x2ce   : > { %1657 = vmatprep.subr.bf16.mxu1 %v1517_v46  ;;  %v1512_v37 = vmul.f32 %v1501_v35, %v1478_v27  ;;  %v1513_v56 = vmul.f32 %v1505_v61, %v1494_v45 }
 0x2cf   : > { %v1473_v49 = vpop.permute.xlu1 %1472  ;;  %1658 = vmatpush1.bf16.msra.mxu1 %v1516_v42 }
 0x2d0   : > { %v1475_v4 = vpop.permute.xlu0 %1474 }
 0x2d1   : > { %v1479_v39 = vsel %vm727_vm7, %v1473_v49, %v1475_v4  ;;  %v1495_v2 = vsel %vm727_vm7, %v1475_v4, %v1473_v49 }
 0x2d2   : > { %v1514_v18 = vmul.f32 %v1501_v35, %v1479_v39  ;;  %v1515_v44 = vmul.f32 %v1505_v61, %v1495_v2  ;;  %1647 = vmatmul.mubr.bf16.gmra.mrb[4].mxu1 %v1880_v47 }
 0x2d3   : > { %1689 = vmatprep.mubr.bf16.mxu1 %v1907_v22 }
 0x2d4   : > { %v1518_v6 = vpack.c.bf16 %v1514_v18, %v1512_v37  ;;  %v1519_v57 = vpack.c.bf16 %v1515_v44, %v1513_v56 }
 0x2d6   : > { %1659 = vmatprep.subr.bf16.mxu1 %v1519_v57 }
 0x2d7   : > { %1660 = vmatpush1.bf16.msra.mxu1 %v1518_v6 }
 0x2da   : > { %1818 = vmatmul.mubr.msk.bf16.vlgmr.msra.gmra.mrb[0].mxu1 %vm875_vm8, %v1881_v58 }
 0x2db   : > { %1699 = vmatprep.mubr.bf16.mxu1 %v1907_v22 }
 0x2e2   : > { %1819 = vmatmul.mubr.msk.bf16.gmra.mrb[4].mxu1 %vm875_vm8, %v1882_v59 }
 0x3ad   : > { %v1691_v21 = vpop.f32.mrb[0].mxu1 }
 0x3ae   : > { %v1710_v22 = vadd.f32 %v1883_v0, %v1691_v21  ;;  %v1693_v51 = vpop.f32.mrb[1].mxu1 }
 0x3af   : > { %v1711_v8 = vadd.f32 %v1884_v63, %v1693_v51  ;;  %v1695_v53 = vpop.f32.mrb[2].mxu1 }
 0x3b0   : > { %1718 = vst [vmem:[%s2605_s21] sm:$0xff] %v1710_v22  ;;  %v1712_v60 = vadd.f32 %v1885_v12, %v1695_v53  ;;  %v1697_v14 = vpop.f32.mrb[3].mxu1 }
 0x3b1   : > { %1719 = vst [vmem:[%s2605_s21 + $0x8] sm:$0xff] %v1711_v8  ;;  %v1713_v17 = vadd.f32 %v1886_v15, %v1697_v14 }
 0x3b2   : > { %1720 = vst [vmem:[%s2605_s21 + $0x10] sm:$0xff] %v1712_v60 }
 0x3b3   : > { %1721 = vst [vmem:[%s2605_s21 + $0x18] sm:$0xff] %v1713_v17 }
 0x3b5   : > { %v1701_v3 = vpop.f32.mrb[4].mxu1 }
 0x3b6   : > { %v1714_v7 = vadd.f32 %v1887_v5, %v1701_v3  ;;  %v1703_v54 = vpop.f32.mrb[5].mxu1 }
 0x3b7   : > { %v1715_v23 = vadd.f32 %v1888_v55, %v1703_v54  ;;  %v1705_v30 = vpop.f32.mrb[6].mxu1 }
 0x3b8   : > { %1722 = vst [vmem:[%s2605_s21 + $0x20] sm:$0xff] %v1714_v7  ;;  %v1716_v24 = vadd.f32 %v1889_v50, %v1705_v30  ;;  %v1707_v52 = vpop.f32.mrb[7].mxu1 }
 0x3b9   : > { %1723 = vst [vmem:[%s2605_s21 + $0x28] sm:$0xff] %v1715_v23  ;;  %v1717_v9 = vadd.f32 %v1890_v19, %v1707_v52 }
 0x3ba   : > { %1724 = vst [vmem:[%s2605_s21 + $0x30] sm:$0xff] %v1716_v24 }
 0x3bb   : > { %1725 = vst [vmem:[%s2605_s21 + $0x38] sm:$0xff] %v1717_v9 }
 0x3bc PF: > { %s15_s18 = sadd.s32 1, %s1897_s18  }
 0x3bd   : > { %p12_p4 = scmp.ge.s32.totalorder %s15_s18, 4  }
 0x3bf   :  { %14 = sbr.rel (!%p12_p4) target bundleno = 1 (0x1), region = 77 }

</bundles_post_ra>
